<compile_context>
chip_gen: v7x
topology: tpu7x:2x2x1
jax: 0.10.0
libtpu: 0.0.40
codegen_flags: <defaults>
</compile_context>

<pallas_src>
import functools

import jax
import jax.numpy as jnp
from jax import lax
from jax.experimental import pallas as pl
from jax.experimental.pallas import tpu as pltpu


# Contract dim-1 of both operands (A @ B^T): consumes PyTorch's [out, in]
# weight layout directly, no wrapper-side transpose copies.
_DN_NT = (((1,), (1,)), ((), ()))


def _pick_tile(n, target):
    """Largest multiple-of-8 divisor of n that is <= target, else n (full dim)."""
    if n <= target:
        return n
    t = target - (target % 8)
    while t >= 8:
        if n % t == 0:
            return t
        t -= 8
    return n


def _vmem_limit(blocks, resident=0, scratch=0):
    """Per-call VMEM budget: 2x (double-buffered) pipeline blocks + residents
    + scratch, 1.5x headroom, clamped to [8 MiB, 48 MiB] (v7x-safe)."""
    need = 2 * sum(blocks) + resident + scratch
    return int(min(48 * 1024 * 1024, max(8 * 1024 * 1024, (3 * need) // 2)))


# ---------------------------------------------------------------------------
# Kernel 1: fused Q/K/V projections, grid = (B, S//ts), both "parallel".
#   x blocks [1, ts, D]; weights resident [U, D] in compute dtype.
#   Softmax scale is folded into Q ([ts,U] mul instead of an [h,tq,tk] mul).
#   Outputs stay f32 (K/V are also the module's returned kv_past).
# ---------------------------------------------------------------------------
def _qkv_kernel_self(x_ref, wq_ref, wk_ref, wv_ref, q_ref, k_ref, v_ref, *, scale):
    x = x_ref[0].astype(wq_ref.dtype)                      # one DMA, reused 3x
    q = lax.dot_general(x, wq_ref[...], _DN_NT, preferred_element_type=jnp.float32)
    q_ref[0] = q * scale
    k_ref[0] = lax.dot_general(x, wk_ref[...], _DN_NT, preferred_element_type=jnp.float32)
    v_ref[0] = lax.dot_general(x, wv_ref[...], _DN_NT, preferred_element_type=jnp.float32)


def _qkv_kernel_cross(x_ref, kx_ref, wq_ref, wk_ref, wv_ref, q_ref, k_ref, v_ref, *, scale):
    cd = wq_ref.dtype
    x = x_ref[0].astype(cd)
    kx = kx_ref[0].astype(cd)
    q = lax.dot_general(x, wq_ref[...], _DN_NT, preferred_element_type=jnp.float32)
    q_ref[0] = q * scale
    k_ref[0] = lax.dot_general(kx, wk_ref[...], _DN_NT, preferred_element_type=jnp.float32)
    v_ref[0] = lax.dot_general(kx, wv_ref[...], _DN_NT, preferred_element_type=jnp.float32)


# ---------------------------------------------------------------------------
# Kernel 2: flash-style attention over all h heads of one batch.
#   grid = (B, S//tq, S//tk); kv axis innermost + "arbitrary"; online softmax
#   with m/l/acc in VMEM scratch.  MXU operands cast to the compute dtype,
#   f32 accumulation.  Exact divide in the finalize step.
# ---------------------------------------------------------------------------
def _flash_attn_kernel(q_ref, k_ref, v_ref, o_ref, m_scr, l_scr, acc_scr, *,
                       compute_dtype):
    ki = pl.program_id(2)

    @pl.when(ki == 0)
    def _init():
        m_scr[...] = jnp.full(m_scr.shape, -jnp.inf, m_scr.dtype)
        l_scr[...] = jnp.zeros(l_scr.shape, l_scr.dtype)
        acc_scr[...] = jnp.zeros(acc_scr.shape, acc_scr.dtype)

    q = q_ref[...].astype(compute_dtype)      # [h, tq, C]  (scale pre-folded)
    k = k_ref[...].astype(compute_dtype)      # [h, tk, C]
    v = v_ref[...].astype(compute_dtype)      # [h, tk, C]

    s = jnp.einsum('hqc,hkc->hqk', q, k, preferred_element_type=jnp.float32)

    m_prev = m_scr[...]
    m_next = jnp.maximum(m_prev, jnp.max(s, axis=-1, keepdims=True))
    alpha = jnp.exp(m_prev - m_next)
    p = jnp.exp(s - m_next)
    l_scr[...] = alpha * l_scr[...] + jnp.sum(p, axis=-1, keepdims=True)
    acc_scr[...] = alpha * acc_scr[...] + jnp.einsum(
        'hqk,hkc->hqc', p.astype(compute_dtype), v,
        preferred_element_type=jnp.float32)
    m_scr[...] = m_next

    @pl.when(ki == pl.num_programs(2) - 1)
    def _finalize():
        o_ref[...] = (acc_scr[...] / l_scr[...]).astype(o_ref.dtype)


# ---------------------------------------------------------------------------
# Kernel 3: output projection (+bias), residual add, LayerNorm (eps=1e-5).
#   grid = (B, S//ts), both "parallel".  LN uses centered (two-pass) variance.
#   bias/gamma/beta arrive packed as one [3, U] f32 block.
# ---------------------------------------------------------------------------
def _proj_ln_kernel(a_ref, res_ref, wp_ref, lnp_ref, o_ref, *, eps):
    a = a_ref[0].astype(wp_ref.dtype)                      # [ts, U]
    y = lax.dot_general(a, wp_ref[...], _DN_NT, preferred_element_type=jnp.float32)
    lnp = lnp_ref[...]                                     # [3, U]: bias, gamma, beta
    y = y + lnp[0:1, :] + res_ref[0]                       # bias + residual (f32)
    mean = jnp.mean(y, axis=-1, keepdims=True)
    yc = y - mean
    var = jnp.mean(yc * yc, axis=-1, keepdims=True)
    o_ref[0] = (yc * lax.rsqrt(var + eps)) * lnp[1:2, :] + lnp[2:3, :]


# ---------------------------------------------------------------------------
# One-time parameter prep (outside the jitted forward): weight dtype cast and
# LN/bias packing happen once, not per call.
# ---------------------------------------------------------------------------
def prepare_params(params, compute_dtype=jnp.bfloat16):
    wq, wk, wv, wp, bp, gamma, beta = params
    cd = jnp.dtype(compute_dtype)
    ln_pack = jnp.stack([bp, gamma, beta]).astype(jnp.float32)   # [3, U]
    return (wq.astype(cd), wk.astype(cd), wv.astype(cd), wp.astype(cd), ln_pack)


# ---------------------------------------------------------------------------
# Forward.  keys=None -> self-attention specialization (input DMA'd once).
# ---------------------------------------------------------------------------
@functools.partial(jax.jit, static_argnames=("h",))
def multi_head_attention(query, prepared, h, keys=None):
    wq, wk, wv, wp, ln_pack = prepared
    cd = wq.dtype                                   # MXU compute dtype
    f32 = jnp.float32
    cbytes = jnp.dtype(cd).itemsize
    fbytes = 4

    B, S, D = query.shape
    U = D                                           # num_units == query_dim
    C = U // h
    scale = float(D) ** (-0.5)                      # module uses key_dim**-0.5

    ts = _pick_tile(S, 256)
    nts = S // ts

    # ---- kernel 1: fused Q/K/V projections ---------------------------------
    x_spec = pl.BlockSpec((1, ts, D), lambda b, si: (b, si, 0))
    w_spec = pl.BlockSpec((U, D), lambda b, si: (0, 0))
    o_spec = pl.BlockSpec((1, ts, U), lambda b, si: (b, si, 0))
    if keys is None:
        kernel1 = functools.partial(_qkv_kernel_self, scale=scale)
        in1 = [x_spec, w_spec, w_spec, w_spec]
        args1 = (query, wq, wk, wv)
        n_x = 1
    else:
        kernel1 = functools.partial(_qkv_kernel_cross, scale=scale)
        in1 = [x_spec, x_spec, w_spec, w_spec, w_spec]
        args1 = (query, keys, wq, wk, wv)
        n_x = 2
    vmem1 = _vmem_limit(
        blocks=[ts * D * fbytes] * n_x + [ts * U * fbytes] * 3,
        resident=3 * U * D * cbytes)
    q3, k3, v3 = pl.pallas_call(
        kernel1,
        grid=(B, nts),
        in_specs=in1,
        out_specs=[o_spec, o_spec, o_spec],
        out_shape=[jax.ShapeDtypeStruct((B, S, U), f32)] * 3,
        compiler_params=pltpu.CompilerParams(
            dimension_semantics=("parallel", "parallel"),
            vmem_limit_bytes=vmem1),
    )(*args1)

    # The module's flat torch .view ([B,S,U] -> [B*h,S,C]); left at the XLA
    # level (minor-dim relayout) -- also K/V in this form ARE the kv_past
    # return values, so they must be materialized like this regardless.
    Qh = q3.reshape(B * h, S, C)
    Kh = k3.reshape(B * h, S, C)
    Vh = v3.reshape(B * h, S, C)
    kv_past = (Kh, Vh)

    # ---- kernel 2: flash attention, all heads of a batch per program -------
    tq = _pick_tile(S, 256)
    tk = _pick_tile(S, 512)
    nq, nk = S // tq, S // tk
    qh_spec = pl.BlockSpec((h, tq, C), lambda b, qi, ki: (b, qi, 0))
    kv_spec = pl.BlockSpec((h, tk, C), lambda b, qi, ki: (b, ki, 0))
    ctx_spec = pl.BlockSpec((h, tq, C), lambda b, qi, ki: (b, qi, 0))
    vmem2 = _vmem_limit(
        blocks=[h * tq * C * fbytes, 2 * h * tk * C * fbytes, h * tq * C * fbytes],
        scratch=h * tq * (2 + C) * fbytes + h * tq * tk * fbytes)
    ctx = pl.pallas_call(
        functools.partial(_flash_attn_kernel, compute_dtype=cd),
        grid=(B, nq, nk),
        in_specs=[qh_spec, kv_spec, kv_spec],
        out_specs=ctx_spec,
        out_shape=jax.ShapeDtypeStruct((B * h, S, C), f32),
        scratch_shapes=[
            pltpu.VMEM((h, tq, 1), f32),    # running max m
            pltpu.VMEM((h, tq, 1), f32),    # running denom l
            pltpu.VMEM((h, tq, C), f32),    # running numerator acc
        ],
        compiler_params=pltpu.CompilerParams(
            dimension_semantics=("parallel", "parallel", "arbitrary"),
            vmem_limit_bytes=vmem2),
    )(Qh, Kh, Vh)

    # reverse view back to [B, S, U]
    a3 = ctx.reshape(B, S, U)

    # ---- kernel 3: proj + residual + LayerNorm ------------------------------
    a_spec = pl.BlockSpec((1, ts, U), lambda b, si: (b, si, 0))
    res_spec = pl.BlockSpec((1, ts, D), lambda b, si: (b, si, 0))
    wp_spec = pl.BlockSpec((U, U), lambda b, si: (0, 0))
    lnp_spec = pl.BlockSpec((3, U), lambda b, si: (0, 0))
    vmem3 = _vmem_limit(
        blocks=[ts * U * fbytes, ts * D * fbytes, ts * U * fbytes],
        resident=U * U * cbytes + 3 * U * fbytes)
    out = pl.pallas_call(
        functools.partial(_proj_ln_kernel, eps=1e-5),
        grid=(B, nts),
        in_specs=[a_spec, res_spec, wp_spec, lnp_spec],
        out_specs=a_spec,
        out_shape=jax.ShapeDtypeStruct((B, S, U), f32),
        compiler_params=pltpu.CompilerParams(
            dimension_semantics=("parallel", "parallel"),
            vmem_limit_bytes=vmem3),
    )(a3, query, wp, ln_pack)

    return out, kv_past


# ---------------------------------------------------------------------------
# Pure-JAX reference (sanity check)
# ---------------------------------------------------------------------------
def reference(query, keys, params, h):
    wq, wk, wv, wp, bp, gamma, beta = params
    B, S, D = query.shape
    U, C = D, D // h
    Q = query @ wq.T
    K = keys @ wk.T
    V = keys @ wv.T
    Qh, Kh, Vh = (t.reshape(B * h, S, C) for t in (Q, K, V))
    att = jnp.einsum('bsc,btc->bst', Qh, Kh) * (float(D) ** -0.5)
    att = jax.nn.softmax(att, axis=-1)
    ctx = jnp.einsum('bst,btc->bsc', att, Vh)
    y = ctx.reshape(B * S, U) @ wp.T + bp
    y = y.reshape(B, S, U) + query
    mean = y.mean(-1, keepdims=True)
    var = ((y - mean) ** 2).mean(-1, keepdims=True)
    out = (y - mean) / jnp.sqrt(var + 1e-5) * gamma + beta
    return out, (Kh, Vh)


if __name__ == "__main__":
    B, S, D, H = 2, 8, 32, 8        # query_dim = key_dim = num_units = 32, h = 8
    key = jax.random.PRNGKey(0)
    k_q, k_k, k_wq, k_wk, k_wv, k_wp, k_bp = jax.random.split(key, 7)

    query = jax.random.normal(k_q, (B, S, D), dtype=jnp.float32)
    keys = jax.random.normal(k_k, (B, S, D), dtype=jnp.float32)

    # deterministic parameter init (mirrors init_weight: U(-0.1, 0.1))
    wq = jax.random.uniform(k_wq, (D, D), jnp.float32, -0.1, 0.1)
    wk = jax.random.uniform(k_wk, (D, D), jnp.float32, -0.1, 0.1)
    wv = jax.random.uniform(k_wv, (D, D), jnp.float32, -0.1, 0.1)
    wp = jax.random.uniform(k_wp, (D, D), jnp.float32, -0.1, 0.1)
    bp = jax.random.uniform(k_bp, (D,), jnp.float32, -0.1, 0.1)
    gamma = jnp.ones((D,), jnp.float32)     # LayerNorm default init
    beta = jnp.zeros((D,), jnp.float32)
    params = (wq, wk, wv, wp, bp, gamma, beta)

    # --- 1) bf16-MXU path, self-attention specialization --------------------
    prep_bf16 = prepare_params(params, jnp.bfloat16)
    out_b, (Kp_b, Vp_b) = multi_head_attention(query, prep_bf16, h=H)   # keys=None
    jax.block_until_ready((out_b, Kp_b, Vp_b))
    ref_b, (rK_b, rV_b) = reference(query, query, params, H)
    assert out_b.shape == (B, S, D)
    assert Kp_b.shape == (B * H, S, D // H)
    assert jnp.allclose(out_b, ref_b, atol=2e-2, rtol=2e-2)
    assert jnp.allclose(Kp_b, rK_b, atol=2e-2, rtol=2e-2)
    assert jnp.allclose(Vp_b, rV_b, atol=2e-2, rtol=2e-2)

    # --- 2) f32 exact-parity path, cross-attention ---------------------------
    prep_f32 = prepare_params(params, jnp.float32)
    out_f, (Kp_f, Vp_f) = multi_head_attention(query, prep_f32, h=H, keys=keys)
    jax.block_until_ready((out_f, Kp_f, Vp_f))
    ref_f, (rK_f, rV_f) = reference(query, keys, params, H)
    assert jnp.allclose(out_f, ref_f, atol=2e-3, rtol=2e-3)
    assert jnp.allclose(Kp_f, rK_f, atol=1e-3, rtol=1e-3)
    assert jnp.allclose(Vp_f, rV_f, atol=1e-3, rtol=1e-3)

    print("KERNEL_OK")
</pallas_src>

<mosaic_0001>
module attributes {stable_mosaic.version = 11 : i64} {
  func.func @_qkv_kernel_self(%arg0: i32, %arg1: i32, %arg2: memref<1x8x32xf32, #tpu.memory_space<vmem>>, %arg3: memref<32x32xbf16, #tpu.memory_space<vmem>>, %arg4: memref<32x32xbf16, #tpu.memory_space<vmem>>, %arg5: memref<32x32xbf16, #tpu.memory_space<vmem>>, %arg6: memref<1x8x32xf32, #tpu.memory_space<vmem>>, %arg7: memref<1x8x32xf32, #tpu.memory_space<vmem>>, %arg8: memref<1x8x32xf32, #tpu.memory_space<vmem>>) attributes {dimension_semantics = [#tpu.dimension_semantics<parallel>, #tpu.dimension_semantics<parallel>], iteration_bounds = array<i64: 2, 1>, scalar_prefetch = 0 : i64, scratch_operands = 0 : i64, tpu.core_type = #tpu.core_type<tc>, window_params = [{transform_indices = @transform_0, window_bounds = array<i64: 1, 8, 32>}, {pipeline_mode = #tpu.pipeline_mode<synchronous>, transform_indices = @transform_1, window_bounds = array<i64: 32, 32>}, {pipeline_mode = #tpu.pipeline_mode<synchronous>, transform_indices = @transform_2, window_bounds = array<i64: 32, 32>}, {pipeline_mode = #tpu.pipeline_mode<synchronous>, transform_indices = @transform_3, window_bounds = array<i64: 32, 32>}, {transform_indices = @transform_4, window_bounds = array<i64: 1, 8, 32>}, {transform_indices = @transform_5, window_bounds = array<i64: 1, 8, 32>}, {transform_indices = @transform_6, window_bounds = array<i64: 1, 8, 32>}]} {
    %c0 = arith.constant 0 : index
    %c0_0 = arith.constant 0 : index
    %c0_1 = arith.constant 0 : index
    %0 = vector.load %arg2[%c0, %c0_0, %c0_1] : memref<1x8x32xf32, #tpu.memory_space<vmem>>, vector<1x8x32xf32>
    %1 = vector.shape_cast %0 : vector<1x8x32xf32> to vector<8x32xf32>
    %2 = arith.truncf %1 : vector<8x32xf32> to vector<8x32xbf16>
    %c0_2 = arith.constant 0 : index
    %c0_3 = arith.constant 0 : index
    %3 = vector.load %arg3[%c0_2, %c0_3] : memref<32x32xbf16, #tpu.memory_space<vmem>>, vector<32x32xbf16>
    %cst = arith.constant dense<0.000000e+00> : vector<8x32xf32>
    %4 = tpu.matmul %2, %3, %cst {dimension_numbers = #tpu.dot_dimension_numbers<[1], [1], [0], [0], [0, 0, 1, 0], [], []>} : vector<8x32xbf16>, vector<32x32xbf16>, vector<8x32xf32> -> vector<8x32xf32>
    %cst_4 = arith.constant 0.176776692 : f32
    %5 = vector.broadcast %cst_4 : f32 to vector<8x32xf32>
    %6 = arith.mulf %4, %5 : vector<8x32xf32>
    %c0_5 = arith.constant 0 : index
    %c0_6 = arith.constant 0 : index
    %c0_7 = arith.constant 0 : index
    %7 = vector.load %arg6[%c0_5, %c0_6, %c0_7] : memref<1x8x32xf32, #tpu.memory_space<vmem>>, vector<1x8x32xf32>
    %8 = vector.shape_cast %7 : vector<1x8x32xf32> to vector<8x32xf32>
    %9 = vector.shape_cast %6 : vector<8x32xf32> to vector<1x8x32xf32>
    tpu.vector_store %arg6[%c0_5, %c0_6, %c0_7], %9 {strides = array<i32>} : memref<1x8x32xf32, #tpu.memory_space<vmem>>, vector<1x8x32xf32>,
    %c0_8 = arith.constant 0 : index
    %c0_9 = arith.constant 0 : index
    %10 = vector.load %arg4[%c0_8, %c0_9] : memref<32x32xbf16, #tpu.memory_space<vmem>>, vector<32x32xbf16>
    %cst_10 = arith.constant dense<0.000000e+00> : vector<8x32xf32>
    %11 = tpu.matmul %2, %10, %cst_10 {dimension_numbers = #tpu.dot_dimension_numbers<[1], [1], [0], [0], [0, 0, 1, 0], [], []>} : vector<8x32xbf16>, vector<32x32xbf16>, vector<8x32xf32> -> vector<8x32xf32>
    %c0_11 = arith.constant 0 : index
    %c0_12 = arith.constant 0 : index
    %c0_13 = arith.constant 0 : index
    %12 = vector.load %arg7[%c0_11, %c0_12, %c0_13] : memref<1x8x32xf32, #tpu.memory_space<vmem>>, vector<1x8x32xf32>
    %13 = vector.shape_cast %12 : vector<1x8x32xf32> to vector<8x32xf32>
    %14 = vector.shape_cast %11 : vector<8x32xf32> to vector<1x8x32xf32>
    tpu.vector_store %arg7[%c0_11, %c0_12, %c0_13], %14 {strides = array<i32>} : memref<1x8x32xf32, #tpu.memory_space<vmem>>, vector<1x8x32xf32>,
    %c0_14 = arith.constant 0 : index
    %c0_15 = arith.constant 0 : index
    %15 = vector.load %arg5[%c0_14, %c0_15] : memref<32x32xbf16, #tpu.memory_space<vmem>>, vector<32x32xbf16>
    %cst_16 = arith.constant dense<0.000000e+00> : vector<8x32xf32>
    %16 = tpu.matmul %2, %15, %cst_16 {dimension_numbers = #tpu.dot_dimension_numbers<[1], [1], [0], [0], [0, 0, 1, 0], [], []>} : vector<8x32xbf16>, vector<32x32xbf16>, vector<8x32xf32> -> vector<8x32xf32>
    %c0_17 = arith.constant 0 : index
    %c0_18 = arith.constant 0 : index
    %c0_19 = arith.constant 0 : index
    %17 = vector.load %arg8[%c0_17, %c0_18, %c0_19] : memref<1x8x32xf32, #tpu.memory_space<vmem>>, vector<1x8x32xf32>
    %18 = vector.shape_cast %17 : vector<1x8x32xf32> to vector<8x32xf32>
    %19 = vector.shape_cast %16 : vector<8x32xf32> to vector<1x8x32xf32>
    tpu.vector_store %arg8[%c0_17, %c0_18, %c0_19], %19 {strides = array<i32>} : memref<1x8x32xf32, #tpu.memory_space<vmem>>, vector<1x8x32xf32>,
    return
  }
  func.func @transform_0(%arg0: i32, %arg1: i32) -> (i32, i32, i32) {
    %c0_i32 = arith.constant 0 : i32
    %c0_i32_0 = arith.constant 0 : i32
    return %arg0, %arg1, %c0_i32 : i32, i32, i32
  }
  func.func @transform_1(%arg0: i32, %arg1: i32) -> (i32, i32) {
    %c0_i32 = arith.constant 0 : i32
    %c0_i32_0 = arith.constant 0 : i32
    %c0_i32_1 = arith.constant 0 : i32
    return %c0_i32, %c0_i32_0 : i32, i32
  }
  func.func @transform_2(%arg0: i32, %arg1: i32) -> (i32, i32) {
    %c0_i32 = arith.constant 0 : i32
    %c0_i32_0 = arith.constant 0 : i32
    %c0_i32_1 = arith.constant 0 : i32
    return %c0_i32, %c0_i32_0 : i32, i32
  }
  func.func @transform_3(%arg0: i32, %arg1: i32) -> (i32, i32) {
    %c0_i32 = arith.constant 0 : i32
    %c0_i32_0 = arith.constant 0 : i32
    %c0_i32_1 = arith.constant 0 : i32
    return %c0_i32, %c0_i32_0 : i32, i32
  }
  func.func @transform_4(%arg0: i32, %arg1: i32) -> (i32, i32, i32) {
    %c0_i32 = arith.constant 0 : i32
    %c0_i32_0 = arith.constant 0 : i32
    return %arg0, %arg1, %c0_i32 : i32, i32, i32
  }
  func.func @transform_5(%arg0: i32, %arg1: i32) -> (i32, i32, i32) {
    %c0_i32 = arith.constant 0 : i32
    %c0_i32_0 = arith.constant 0 : i32
    return %arg0, %arg1, %c0_i32 : i32, i32, i32
  }
  func.func @transform_6(%arg0: i32, %arg1: i32) -> (i32, i32, i32) {
    %c0_i32 = arith.constant 0 : i32
    %c0_i32_0 = arith.constant 0 : i32
    return %arg0, %arg1, %c0_i32 : i32, i32, i32
  }
}

module attributes {stable_mosaic.version = 11 : i64} {
  func.func @_flash_attn_kernel(%arg0: i32, %arg1: i32, %arg2: i32, %arg3: memref<8x8x4xf32, #tpu.memory_space<vmem>>, %arg4: memref<8x8x4xf32, #tpu.memory_space<vmem>>, %arg5: memref<8x8x4xf32, #tpu.memory_space<vmem>>, %arg6: memref<8x8x4xf32, #tpu.memory_space<vmem>>, %arg7: memref<8x8x1xf32, #tpu.memory_space<vmem>>, %arg8: memref<8x8x1xf32, #tpu.memory_space<vmem>>, %arg9: memref<8x8x4xf32, #tpu.memory_space<vmem>>) attributes {dimension_semantics = [#tpu.dimension_semantics<parallel>, #tpu.dimension_semantics<parallel>, #tpu.dimension_semantics<arbitrary>], iteration_bounds = array<i64: 2, 1, 1>, scalar_prefetch = 0 : i64, scratch_operands = 3 : i64, tpu.core_type = #tpu.core_type<tc>, window_params = [{transform_indices = @transform_0, window_bounds = array<i64: 8, 8, 4>}, {transform_indices = @transform_1, window_bounds = array<i64: 8, 8, 4>}, {transform_indices = @transform_2, window_bounds = array<i64: 8, 8, 4>}, {transform_indices = @transform_3, window_bounds = array<i64: 8, 8, 4>}]} {
    %c0_i32 = arith.constant 0 : i32
    %0 = arith.cmpi eq, %arg2, %c0_i32 : i32
    %1 = arith.extui %0 : i1 to i32
    %c0_i32_0 = arith.constant 0 : i32
    %2 = arith.cmpi ne, %1, %c0_i32_0 : i32
    scf.if %2 {
      %cst_32 = arith.constant 0xFF800000 : f32
      %36 = vector.broadcast %cst_32 : f32 to vector<8x8x1xf32>
      %c0_33 = arith.constant 0 : index
      %c0_34 = arith.constant 0 : index
      %c0_35 = arith.constant 0 : index
      %37 = vector.load %arg7[%c0_33, %c0_34, %c0_35] : memref<8x8x1xf32, #tpu.memory_space<vmem>>, vector<8x8x1xf32>
      tpu.vector_store %arg7[%c0_33, %c0_34, %c0_35], %36 {strides = array<i32>} : memref<8x8x1xf32, #tpu.memory_space<vmem>>, vector<8x8x1xf32>,
      %cst_36 = arith.constant 0.000000e+00 : f32
      %38 = vector.broadcast %cst_36 : f32 to vector<8x8x1xf32>
      %c0_37 = arith.constant 0 : index
      %c0_38 = arith.constant 0 : index
      %c0_39 = arith.constant 0 : index
      %39 = vector.load %arg8[%c0_37, %c0_38, %c0_39] : memref<8x8x1xf32, #tpu.memory_space<vmem>>, vector<8x8x1xf32>
      tpu.vector_store %arg8[%c0_37, %c0_38, %c0_39], %38 {strides = array<i32>} : memref<8x8x1xf32, #tpu.memory_space<vmem>>, vector<8x8x1xf32>,
      %cst_40 = arith.constant 0.000000e+00 : f32
      %40 = vector.broadcast %cst_40 : f32 to vector<8x8x4xf32>
      %c0_41 = arith.constant 0 : index
      %c0_42 = arith.constant 0 : index
      %c0_43 = arith.constant 0 : index
      %41 = vector.load %arg9[%c0_41, %c0_42, %c0_43] : memref<8x8x4xf32, #tpu.memory_space<vmem>>, vector<8x8x4xf32>
      tpu.vector_store %arg9[%c0_41, %c0_42, %c0_43], %40 {strides = array<i32>} : memref<8x8x4xf32, #tpu.memory_space<vmem>>, vector<8x8x4xf32>,
    } else {
    }
    %c0 = arith.constant 0 : index
    %c0_1 = arith.constant 0 : index
    %c0_2 = arith.constant 0 : index
    %3 = vector.load %arg3[%c0, %c0_1, %c0_2] : memref<8x8x4xf32, #tpu.memory_space<vmem>>, vector<8x8x4xf32>
    %4 = arith.truncf %3 : vector<8x8x4xf32> to vector<8x8x4xbf16>
    %c0_3 = arith.constant 0 : index
    %c0_4 = arith.constant 0 : index
    %c0_5 = arith.constant 0 : index
    %5 = vector.load %arg4[%c0_3, %c0_4, %c0_5] : memref<8x8x4xf32, #tpu.memory_space<vmem>>, vector<8x8x4xf32>
    %6 = arith.truncf %5 : vector<8x8x4xf32> to vector<8x8x4xbf16>
    %c0_6 = arith.constant 0 : index
    %c0_7 = arith.constant 0 : index
    %c0_8 = arith.constant 0 : index
    %7 = vector.load %arg5[%c0_6, %c0_7, %c0_8] : memref<8x8x4xf32, #tpu.memory_space<vmem>>, vector<8x8x4xf32>
    %8 = arith.truncf %7 : vector<8x8x4xf32> to vector<8x8x4xbf16>
    "tpu.trace_start"() <{level = 10 : i32, message = "hqc,hkc->hqk"}> : () -> ()
    %cst = arith.constant dense<0.000000e+00> : vector<8x8x8xf32>
    %9 = tpu.matmul %4, %6, %cst {dimension_numbers = #tpu.dot_dimension_numbers<[2], [2], [1], [1], [0, 0, 0, 1, 1, 1], [0], [0]>} : vector<8x8x4xbf16>, vector<8x8x4xbf16>, vector<8x8x8xf32> -> vector<8x8x8xf32>
    "tpu.trace_stop"() : () -> ()
    %c0_9 = arith.constant 0 : index
    %c0_10 = arith.constant 0 : index
    %c0_11 = arith.constant 0 : index
    %10 = vector.load %arg7[%c0_9, %c0_10, %c0_11] : memref<8x8x1xf32, #tpu.memory_space<vmem>>, vector<8x8x1xf32>
    %cst_12 = arith.constant dense<0xFF800000> : vector<8x8xf32>
    %11 = vector.multi_reduction <maximumf>, %9, %cst_12 [2] : vector<8x8x8xf32> to vector<8x8xf32>
    %12 = vector.shape_cast %11 : vector<8x8xf32> to vector<8x8x1xf32>
    %13 = arith.maximumf %10, %12 : vector<8x8x1xf32>
    %14 = arith.subf %10, %13 : vector<8x8x1xf32>
    %15 = math.exp %14 : vector<8x8x1xf32>
    %16 = vector.broadcast %13 : vector<8x8x1xf32> to vector<8x8x8xf32>
    %17 = arith.subf %9, %16 : vector<8x8x8xf32>
    %18 = math.exp %17 : vector<8x8x8xf32>
    %c0_13 = arith.constant 0 : index
    %c0_14 = arith.constant 0 : index
    %c0_15 = arith.constant 0 : index
    %19 = vector.load %arg8[%c0_13, %c0_14, %c0_15] : memref<8x8x1xf32, #tpu.memory_space<vmem>>, vector<8x8x1xf32>
    %20 = arith.mulf %15, %19 : vector<8x8x1xf32>
    %cst_16 = arith.constant dense<0.000000e+00> : vector<8x8xf32>
    %21 = vector.multi_reduction <add>, %18, %cst_16 [2] : vector<8x8x8xf32> to vector<8x8xf32>
    %22 = vector.shape_cast %21 : vector<8x8xf32> to vector<8x8x1xf32>
    %23 = arith.addf %20, %22 : vector<8x8x1xf32>
    %c0_17 = arith.constant 0 : index
    %c0_18 = arith.constant 0 : index
    %c0_19 = arith.constant 0 : index
    %24 = vector.load %arg8[%c0_17, %c0_18, %c0_19] : memref<8x8x1xf32, #tpu.memory_space<vmem>>, vector<8x8x1xf32>
    tpu.vector_store %arg8[%c0_17, %c0_18, %c0_19], %23 {strides = array<i32>} : memref<8x8x1xf32, #tpu.memory_space<vmem>>, vector<8x8x1xf32>,
    %c0_20 = arith.constant 0 : index
    %c0_21 = arith.constant 0 : index
    %c0_22 = arith.constant 0 : index
    %25 = vector.load %arg9[%c0_20, %c0_21, %c0_22] : memref<8x8x4xf32, #tpu.memory_space<vmem>>, vector<8x8x4xf32>
    %26 = vector.broadcast %15 : vector<8x8x1xf32> to vector<8x8x4xf32>
    %27 = arith.mulf %26, %25 : vector<8x8x4xf32>
    %28 = arith.truncf %18 : vector<8x8x8xf32> to vector<8x8x8xbf16>
    "tpu.trace_start"() <{level = 10 : i32, message = "hqk,hkc->hqc"}> : () -> ()
    %cst_23 = arith.constant dense<0.000000e+00> : vector<8x8x4xf32>
    %29 = tpu.matmul %28, %8, %cst_23 {dimension_numbers = #tpu.dot_dimension_numbers<[2], [1], [1], [2], [0, 0, 0, 1, 1, 2], [0], [0]>} : vector<8x8x8xbf16>, vector<8x8x4xbf16>, vector<8x8x4xf32> -> vector<8x8x4xf32>
    "tpu.trace_stop"() : () -> ()
    %30 = arith.addf %27, %29 : vector<8x8x4xf32>
    %c0_24 = arith.constant 0 : index
    %c0_25 = arith.constant 0 : index
    %c0_26 = arith.constant 0 : index
    %31 = vector.load %arg9[%c0_24, %c0_25, %c0_26] : memref<8x8x4xf32, #tpu.memory_space<vmem>>, vector<8x8x4xf32>
    tpu.vector_store %arg9[%c0_24, %c0_25, %c0_26], %30 {strides = array<i32>} : memref<8x8x4xf32, #tpu.memory_space<vmem>>, vector<8x8x4xf32>,
    %c0_27 = arith.constant 0 : index
    %c0_28 = arith.constant 0 : index
    %c0_29 = arith.constant 0 : index
    %32 = vector.load %arg7[%c0_27, %c0_28, %c0_29] : memref<8x8x1xf32, #tpu.memory_space<vmem>>, vector<8x8x1xf32>
    tpu.vector_store %arg7[%c0_27, %c0_28, %c0_29], %13 {strides = array<i32>} : memref<8x8x1xf32, #tpu.memory_space<vmem>>, vector<8x8x1xf32>,
    %c0_i32_30 = arith.constant 0 : i32
    %33 = arith.cmpi eq, %arg2, %c0_i32_30 : i32
    %34 = arith.extui %33 : i1 to i32
    %c0_i32_31 = arith.constant 0 : i32
    %35 = arith.cmpi ne, %34, %c0_i32_31 : i32
    scf.if %35 {
      %c0_32 = arith.constant 0 : index
      %c0_33 = arith.constant 0 : index
      %c0_34 = arith.constant 0 : index
      %36 = vector.load %arg9[%c0_32, %c0_33, %c0_34] : memref<8x8x4xf32, #tpu.memory_space<vmem>>, vector<8x8x4xf32>
      %c0_35 = arith.constant 0 : index
      %c0_36 = arith.constant 0 : index
      %c0_37 = arith.constant 0 : index
      %37 = vector.load %arg8[%c0_35, %c0_36, %c0_37] : memref<8x8x1xf32, #tpu.memory_space<vmem>>, vector<8x8x1xf32>
      %38 = vector.broadcast %37 : vector<8x8x1xf32> to vector<8x8x4xf32>
      %39 = arith.divf %36, %38 : vector<8x8x4xf32>
      %c0_38 = arith.constant 0 : index
      %c0_39 = arith.constant 0 : index
      %c0_40 = arith.constant 0 : index
      %40 = vector.load %arg6[%c0_38, %c0_39, %c0_40] : memref<8x8x4xf32, #tpu.memory_space<vmem>>, vector<8x8x4xf32>
      tpu.vector_store %arg6[%c0_38, %c0_39, %c0_40], %39 {strides = array<i32>} : memref<8x8x4xf32, #tpu.memory_space<vmem>>, vector<8x8x4xf32>,
    } else {
    }
    return
  }
  func.func @transform_0(%arg0: i32, %arg1: i32, %arg2: i32) -> (i32, i32, i32) {
    %c0_i32 = arith.constant 0 : i32
    %c0_i32_0 = arith.constant 0 : i32
    return %arg0, %arg1, %c0_i32 : i32, i32, i32
  }
  func.func @transform_1(%arg0: i32, %arg1: i32, %arg2: i32) -> (i32, i32, i32) {
    %c0_i32 = arith.constant 0 : i32
    %c0_i32_0 = arith.constant 0 : i32
    return %arg0, %arg2, %c0_i32 : i32, i32, i32
  }
  func.func @transform_2(%arg0: i32, %arg1: i32, %arg2: i32) -> (i32, i32, i32) {
    %c0_i32 = arith.constant 0 : i32
    %c0_i32_0 = arith.constant 0 : i32
    return %arg0, %arg2, %c0_i32 : i32, i32, i32
  }
  func.func @transform_3(%arg0: i32, %arg1: i32, %arg2: i32) -> (i32, i32, i32) {
    %c0_i32 = arith.constant 0 : i32
    %c0_i32_0 = arith.constant 0 : i32
    return %arg0, %arg1, %c0_i32 : i32, i32, i32
  }
}

module attributes {stable_mosaic.version = 11 : i64} {
  func.func @_proj_ln_kernel(%arg0: i32, %arg1: i32, %arg2: memref<1x8x32xf32, #tpu.memory_space<vmem>>, %arg3: memref<1x8x32xf32, #tpu.memory_space<vmem>>, %arg4: memref<32x32xbf16, #tpu.memory_space<vmem>>, %arg5: memref<3x32xf32, #tpu.memory_space<vmem>>, %arg6: memref<1x8x32xf32, #tpu.memory_space<vmem>>) attributes {dimension_semantics = [#tpu.dimension_semantics<parallel>, #tpu.dimension_semantics<parallel>], iteration_bounds = array<i64: 2, 1>, scalar_prefetch = 0 : i64, scratch_operands = 0 : i64, tpu.core_type = #tpu.core_type<tc>, window_params = [{transform_indices = @transform_0, window_bounds = array<i64: 1, 8, 32>}, {transform_indices = @transform_1, window_bounds = array<i64: 1, 8, 32>}, {pipeline_mode = #tpu.pipeline_mode<synchronous>, transform_indices = @transform_2, window_bounds = array<i64: 32, 32>}, {pipeline_mode = #tpu.pipeline_mode<synchronous>, transform_indices = @transform_3, window_bounds = array<i64: 3, 32>}, {transform_indices = @transform_4, window_bounds = array<i64: 1, 8, 32>}]} {
    %c0 = arith.constant 0 : index
    %c0_0 = arith.constant 0 : index
    %c0_1 = arith.constant 0 : index
    %0 = vector.load %arg2[%c0, %c0_0, %c0_1] : memref<1x8x32xf32, #tpu.memory_space<vmem>>, vector<1x8x32xf32>
    %1 = vector.shape_cast %0 : vector<1x8x32xf32> to vector<8x32xf32>
    %2 = arith.truncf %1 : vector<8x32xf32> to vector<8x32xbf16>
    %c0_2 = arith.constant 0 : index
    %c0_3 = arith.constant 0 : index
    %3 = vector.load %arg4[%c0_2, %c0_3] : memref<32x32xbf16, #tpu.memory_space<vmem>>, vector<32x32xbf16>
    %cst = arith.constant dense<0.000000e+00> : vector<8x32xf32>
    %4 = tpu.matmul %2, %3, %cst {dimension_numbers = #tpu.dot_dimension_numbers<[1], [1], [0], [0], [0, 0, 1, 0], [], []>} : vector<8x32xbf16>, vector<32x32xbf16>, vector<8x32xf32> -> vector<8x32xf32>
    %c0_4 = arith.constant 0 : index
    %c0_5 = arith.constant 0 : index
    %5 = vector.load %arg5[%c0_4, %c0_5] : memref<3x32xf32, #tpu.memory_space<vmem>>, vector<3x32xf32>
    %6 = vector.extract_strided_slice %5 {offsets = [0, 0], sizes = [1, 32], strides = [1, 1]} : vector<3x32xf32> to vector<1x32xf32>
    %7 = vector.broadcast %6 : vector<1x32xf32> to vector<8x32xf32>
    %8 = arith.addf %4, %7 : vector<8x32xf32>
    %c0_6 = arith.constant 0 : index
    %c0_7 = arith.constant 0 : index
    %c0_8 = arith.constant 0 : index
    %9 = vector.load %arg3[%c0_6, %c0_7, %c0_8] : memref<1x8x32xf32, #tpu.memory_space<vmem>>, vector<1x8x32xf32>
    %10 = vector.shape_cast %9 : vector<1x8x32xf32> to vector<8x32xf32>
    %11 = arith.addf %8, %10 : vector<8x32xf32>
    %cst_9 = arith.constant dense<0.000000e+00> : vector<8xf32>
    %12 = vector.multi_reduction <add>, %11, %cst_9 [1] : vector<8x32xf32> to vector<8xf32>
    %13 = vector.shape_cast %12 : vector<8xf32> to vector<8x1xf32>
    %cst_10 = arith.constant 3.200000e+01 : f32
    %14 = vector.broadcast %cst_10 : f32 to vector<8x1xf32>
    %15 = arith.divf %13, %14 : vector<8x1xf32>
    %16 = vector.broadcast %15 : vector<8x1xf32> to vector<8x32xf32>
    %17 = arith.subf %11, %16 : vector<8x32xf32>
    %18 = arith.mulf %17, %17 : vector<8x32xf32>
    %cst_11 = arith.constant dense<0.000000e+00> : vector<8xf32>
    %19 = vector.multi_reduction <add>, %18, %cst_11 [1] : vector<8x32xf32> to vector<8xf32>
    %20 = vector.shape_cast %19 : vector<8xf32> to vector<8x1xf32>
    %cst_12 = arith.constant 3.200000e+01 : f32
    %21 = vector.broadcast %cst_12 : f32 to vector<8x1xf32>
    %22 = arith.divf %20, %21 : vector<8x1xf32>
    %cst_13 = arith.constant 9.99999974E-6 : f32
    %23 = vector.broadcast %cst_13 : f32 to vector<8x1xf32>
    %24 = arith.addf %22, %23 : vector<8x1xf32>
    %25 = math.rsqrt %24 : vector<8x1xf32>
    %26 = vector.broadcast %25 : vector<8x1xf32> to vector<8x32xf32>
    %27 = arith.mulf %17, %26 : vector<8x32xf32>
    %28 = vector.extract_strided_slice %5 {offsets = [1, 0], sizes = [1, 32], strides = [1, 1]} : vector<3x32xf32> to vector<1x32xf32>
    %29 = vector.broadcast %28 : vector<1x32xf32> to vector<8x32xf32>
    %30 = arith.mulf %27, %29 : vector<8x32xf32>
    %31 = vector.extract_strided_slice %5 {offsets = [2, 0], sizes = [1, 32], strides = [1, 1]} : vector<3x32xf32> to vector<1x32xf32>
    %32 = vector.broadcast %31 : vector<1x32xf32> to vector<8x32xf32>
    %33 = arith.addf %30, %32 : vector<8x32xf32>
    %c0_14 = arith.constant 0 : index
    %c0_15 = arith.constant 0 : index
    %c0_16 = arith.constant 0 : index
    %34 = vector.load %arg6[%c0_14, %c0_15, %c0_16] : memref<1x8x32xf32, #tpu.memory_space<vmem>>, vector<1x8x32xf32>
    %35 = vector.shape_cast %34 : vector<1x8x32xf32> to vector<8x32xf32>
    %36 = vector.shape_cast %33 : vector<8x32xf32> to vector<1x8x32xf32>
    tpu.vector_store %arg6[%c0_14, %c0_15, %c0_16], %36 {strides = array<i32>} : memref<1x8x32xf32, #tpu.memory_space<vmem>>, vector<1x8x32xf32>,
    return
  }
  func.func @transform_0(%arg0: i32, %arg1: i32) -> (i32, i32, i32) {
    %c0_i32 = arith.constant 0 : i32
    %c0_i32_0 = arith.constant 0 : i32
    return %arg0, %arg1, %c0_i32 : i32, i32, i32
  }
  func.func @transform_1(%arg0: i32, %arg1: i32) -> (i32, i32, i32) {
    %c0_i32 = arith.constant 0 : i32
    %c0_i32_0 = arith.constant 0 : i32
    return %arg0, %arg1, %c0_i32 : i32, i32, i32
  }
  func.func @transform_2(%arg0: i32, %arg1: i32) -> (i32, i32) {
    %c0_i32 = arith.constant 0 : i32
    %c0_i32_0 = arith.constant 0 : i32
    %c0_i32_1 = arith.constant 0 : i32
    return %c0_i32, %c0_i32_0 : i32, i32
  }
  func.func @transform_3(%arg0: i32, %arg1: i32) -> (i32, i32) {
    %c0_i32 = arith.constant 0 : i32
    %c0_i32_0 = arith.constant 0 : i32
    %c0_i32_1 = arith.constant 0 : i32
    return %c0_i32, %c0_i32_0 : i32, i32
  }
  func.func @transform_4(%arg0: i32, %arg1: i32) -> (i32, i32, i32) {
    %c0_i32 = arith.constant 0 : i32
    %c0_i32_0 = arith.constant 0 : i32
    return %arg0, %arg1, %c0_i32 : i32, i32, i32
  }
}

</mosaic_0001>

<bundles_post_ra>
// kernel: multi_head_attention.3
= control target key start
LH: loop header
LB: loop body
LE: loop exit
PB: predicated region body
PF: predicated region fallthrough
CT: control target
= control target key end

     0   :  { %12 = vsyncpa [#allocation3], 0  ;;  %s1193_s0 = inlined_call_operand.vmem [shape: f32[2,8,32], index: 0, kind: input, shape index: {}]   ;;  %s1194_s1 = inlined_call_operand.hbm [shape: bf16[32,32], index: 1, kind: input, shape index: {}]   ;;  %s1195_s2 = inlined_call_operand.hbm [shape: bf16[32,32], index: 2, kind: input, shape index: {}]   ;;  %s1196_s3 = inlined_call_operand.hbm [shape: bf16[32,32], index: 3, kind: input, shape index: {}]   ;;  %s1197_s4 = inlined_call_operand.vmem [shape: f32[2,8,32], index: 4, kind: output, shape index: {0}]   ;;  %s1198_s5 = inlined_call_operand.vmem [shape: f32[2,8,32], index: 5, kind: output, shape index: {1}]   ;;  %s1199_s6 = inlined_call_operand.vmem [shape: f32[2,8,32], index: 6, kind: output, shape index: {2}]  }
   0x1   :  { %13 = vsyncpa [#allocation5], 0  ;;  %s1020_s21 = smov 0   ;;  %s1022_s22 = smov 0  }
   0x2   :  { %s1024_s23 = smov 0  }
   0x3 LB: > { %s738_s24 = sadd.s32 4294967295, %s976_s23   ;;  %p740_p0 = scmp.ge.s32.totalorder %s976_s23, 1  ;;  %s976_s23 = sphi %s1024_s23, %s19_s23   ;;  %s972_s22 = sphi %s1022_s22, %s1211_s22   ;;  %s968_s21 = sphi %s1020_s21, %s1210_s21  }
   0x4   : > { %p211_p1 = scmp.lt.s32.totalorder %s976_s23, 3  ;;  %p1038_p2 = scmp.eq.s32.totalorder %s738_s24, 0 }
   0x5   : > { %s978_s27 = smov [#allocation4]   ;;  %s31_s30 = sadd.s32 1, %s972_s22 }
   0x6   : > { %s1203_s25 = scalar_select %p1038_p2, 1, 0 }
   0x7   : > { %p1042_p3 = pnand %p740_p0, %p211_p1  ;;  %s236_s28 = sshll.u32 %s978_s27, 4  ;;  %s1046_s28 = int_to_ptr.vmem [resolvable:$true] %s236_s28 }
   0x8   : > { %p1057_p6 = scmp.ge.s32.totalorder %s31_s30, 2  ;;  %s979_s8 = smov [#allocation2]  }
   0x9   : > { %s1204_s26 = scalar_select %p1042_p3, 1, 0 }
   0xa   : > { %p809_p4 = pneg %p1042_p3  ;;  %s223_s9 = sshll.u32 %s979_s8, 4  ;;  %s224_s9 = int_to_ptr.vmem [resolvable:$true] %s223_s9 }
   0xb   : > { %s862_s12 = scalar_lea.hbm %s1195_s2, 256 }
   0xc   : > { %p1052_p5 = pnand %p1038_p2, %p809_p4  ;;  %p863_p7 = scmp.ne.s32.totalorder %s1195_s2, %s862_s12 }
   0xd   : > { %p869_p11 = scmp.lt.u32.totalorder %s862_s12, %s1195_s2 }
   0xe   : > { %p1069_p8 = pneg %p1052_p5 }
  0x10   : > { %p865_p9 = pnand %p1069_p8, %p863_p7 }
  0x12   : > { %p866_p10 = pneg %p865_p9 }
  0x14   : > { %p871_p12 = pnand %p869_p11, %p866_p10 }
  0x16   : > { %874 = shalt.err (!%p871_p12)
}
  0x17   : > { %s875_s18 = scalar_lea.vmem %s1046_s28, 256  ;;  %p883_p4 = scmp.lt.s32.totalorder %s1046_s28, %s1046_s28 }
  0x18   : > { %p876_p13 = scmp.ne.s32.totalorder %s1046_s28, %s875_s18  ;;  %p884_p2 = scmp.lt.s32.totalorder %s875_s18, %s875_s18 }
  0x1a   : > { %p878_p0 = pnand %p876_p13, %p1069_p8  ;;  %p885_p7 = por %p884_p2, %p883_p4 }
  0x1c   : > { %p879_p1 = pneg %p878_p0 }
  0x1e   : > { %p886_p9 = pnand %p885_p7, %p879_p1 }
  0x20   : > { %889 = shalt.err (!%p886_p9)
}
  0x21   : > { %s980_s19 = smov 64   ;;  %s981_s20 = smov 4  }
  0x22   : > { %815 = dma.hbm_to_vmem [thread:$0]  (!%p1052_p5), %s1195_s2, 256, %s1046_s28, [#allocation5], %s980_s19, %s980_s19, %s981_s20  }
  0x23   : > { %s1213_s30 = smov (%p1057_p6, %s31_s30), 0  ;;  %s890_s11 = scalar_lea.hbm %s1194_s1, 256 }
  0x24   : > { %p891_p2 = scmp.ne.s32.totalorder %s1194_s1, %s890_s11  ;;  %p897_p12 = scmp.lt.u32.totalorder %s890_s11, %s1194_s1 }
  0x26   : > { %p893_p10 = pnand %p891_p2, %p1069_p8 }
  0x28   : > { %p894_p11 = pneg %p893_p10 }
  0x2a   : > { %p899_p13 = pnand %p897_p12, %p894_p11 }
  0x2c   : > { %902 = shalt.err (!%p899_p13)
}
  0x2d   : > { %s903_s28 = scalar_lea.vmem %s224_s9, 256  ;;  %p911_p4 = scmp.lt.s32.totalorder %s224_s9, %s224_s9 }
  0x2e   : > { %p904_p6 = scmp.ne.s32.totalorder %s224_s9, %s903_s28  ;;  %p912_p7 = scmp.lt.s32.totalorder %s903_s28, %s903_s28 }
  0x30   : > { %p906_p0 = pnand %p904_p6, %p1069_p8  ;;  %p913_p9 = por %p912_p7, %p911_p4 }
  0x32   : > { %p907_p1 = pneg %p906_p0 }
  0x34   : > { %p914_p3 = pnand %p913_p9, %p907_p1 }
  0x36   : > { %917 = shalt.err (!%p914_p3)
}
  0x37   : > { %812 = dma.hbm_to_vmem [thread:$0]  (!%p1052_p5), %s1194_s1, 256, %s224_s9, [#allocation3], %s980_s19, %s980_s19, %s981_s20  }
  0x38   : > { %s982_s18 = smov [#allocation6]   ;;  %s918_s10 = scalar_lea.hbm %s1196_s3, 256 }
  0x39   : > { %s249_s24 = sshll.u32 %s982_s18, 4  ;;  %p919_p3 = scmp.ne.s32.totalorder %s1196_s3, %s918_s10  ;;  %s250_s24 = int_to_ptr.vmem [resolvable:$true] %s249_s24 }
  0x3a   : > { %p925_p11 = scmp.lt.u32.totalorder %s918_s10, %s1196_s3 }
  0x3b   : > { %p921_p2 = pnand %p919_p3, %p1069_p8 }
  0x3d   : > { %p922_p10 = pneg %p921_p2 }
  0x3f   : > { %p927_p12 = pnand %p925_p11, %p922_p10 }
  0x41   : > { %930 = shalt.err (!%p927_p12)
}
  0x42   : > { %s931_s9 = scalar_lea.vmem %s250_s24, 256  ;;  %p939_p1 = scmp.lt.s32.totalorder %s250_s24, %s250_s24 }
  0x43   : > { %p932_p13 = scmp.ne.s32.totalorder %s250_s24, %s931_s9  ;;  %p940_p4 = scmp.lt.s32.totalorder %s931_s9, %s931_s9 }
  0x45   : > { %p934_p6 = pnand %p932_p13, %p1069_p8  ;;  %p941_p7 = por %p940_p4, %p939_p1 }
  0x47   : > { %p935_p0 = pneg %p934_p6 }
  0x49   : > { %p942_p9 = pnand %p941_p7, %p935_p0 }
  0x4b   : > { %945 = shalt.err (!%p942_p9)
}
  0x4c   : > { %818 = dma.hbm_to_vmem [thread:$0]  (!%p1052_p5), %s1196_s3, 256, %s250_s24, [#allocation5], %s980_s19, %s980_s19, %s981_s20  }
  0x4d   : > { %p1208_p3 = scmp.ne.s32.totalorder %s1204_s26, 0 }
  0x4e   : > { %p1209_p8 = scmp.ne.s32.totalorder (!%p1208_p3), %s1203_s25, 0 }
  0x4f   : > { %275 = sbr.rel (%p1208_p3) target bundleno = 338 (0x152), region = 36 }
  0x56   : > { %959 = dma.done.wait (%p1209_p8), [#allocation3], 256  }
  0x57   : > { %961 = vsyncadd (%p1209_p8), [#allocation3], 4294967040 }
  0x58   : > { %963 = dma.done.wait (%p1209_p8), [#allocation5], 512  }
  0x59   : > { %965 = vsyncadd (%p1209_p8), [#allocation5], 4294966784  ;;  %v983_v0 = vmov 0.0   ;;  %vm984_vm0 = vmmov 0   ;;  %p331_p5 = scmp.lt.s32.totalorder %s968_s21, 1  ;;  %vm376_vm1 = vcmask 261120  }
  0x5a   : > { %773 = vmatprep.subr.bf16.mxu0 %v983_v0  ;;  %781 = vmatprep.subr.bf16.mxu1 %v983_v0  ;;  %v856_v1 = vld [vmem:[#allocation2] sm:$0xff]   ;;  %v858_v3 = vld [vmem:[#allocation4] sm:$0xff]   ;;  %v857_v4 = vld [vmem:[#allocation2 + $0x8] sm:$0xff]  }
  0x5b   : > { %777 = vmatprep.mubr.msk.bf16.mxu0 %vm984_vm0, %v983_v0  ;;  %785 = vmatprep.mubr.msk.bf16.mxu1 %vm984_vm0, %v983_v0  ;;  %s1215_s21 = smov (!%p331_p5, %s968_s21), 1  ;;  %v381_v2 = vsel %vm376_vm1, %v856_v1, 0  ;;  %v443_v5 = vsel %vm376_vm1, %v858_v3, 0  ;;  %v860_v6 = vld [vmem:[#allocation4 + $0x8] sm:$0xff]   ;;  %v384_v7 = vsel %vm376_vm1, %v857_v4, 0  ;;  %v859_v10 = vld [vmem:[#allocation6] sm:$0xff]  }
  0x5c   : > { %774 = vmatpush3.bf16.xpose.msra.mxu0 %v381_v2  ;;  %782 = vmatpush3.bf16.xpose.msra.mxu1 %v443_v5  ;;  %s1155_s25 = sshll.u32 %s1215_s21, 3  ;;  %v446_v8 = vsel %vm376_vm1, %v860_v6, 0  ;;  %v504_v12 = vsel %vm376_vm1, %v859_v10, 0  ;;  %v861_v13 = vld [vmem:[#allocation6 + $0x8] sm:$0xff]  }
  0x5d   : > { %775 = vmatprep.subr.bf16.mxu0 %v983_v0  ;;  %783 = vmatprep.subr.bf16.mxu1 %v983_v0  ;;  %s337_s15 = scalar_lea.vmem %s1193_s0, %s1155_s25  ;;  %v507_v14 = vsel %vm376_vm1, %v861_v13, 0  ;;  %s344_s20 = scalar_lea.vmem %s1197_s4, %s1155_s25 }
  0x5e   : > { %v360_v9 = vld [vmem:[%s337_s15] sm:$0xff]  ;;  %s351_s18 = scalar_lea.vmem %s1198_s5, %s1155_s25  ;;  %s358_s8 = scalar_lea.vmem %s1199_s6, %s1155_s25 }
  0x5f   : > { %v361_v11 = vpack.c.bf16 %v360_v9, %v360_v9 }
  0x64   : > { %776 = vmatpush3.bf16.xpose.msra.mxu0 %v384_v7  ;;  %784 = vmatpush3.bf16.xpose.msra.mxu1 %v446_v8 }
  0x65   : > { %789 = vmatprep.subr.bf16.mxu0 %v983_v0 }
  0x6b   : > { %778 = vmatmul.mubr.msk.bf16.vlgmr.msra.gmra.mrb[0].mxu0 %vm376_vm1, %v361_v11  ;;  %786 = vmatmul.mubr.msk.bf16.vlgmr.msra.gmra.mrb[0].mxu1 %vm376_vm1, %v361_v11 }
  0x6c   : > { %790 = vmatpush3.bf16.xpose.msra.mxu0 %v504_v12  ;;  %793 = vmatprep.mubr.msk.bf16.mxu0 %vm984_vm0, %v983_v0 }
  0x6d   : > { %791 = vmatprep.subr.bf16.mxu0 %v983_v0 }
  0x74   : > { %792 = vmatpush3.bf16.xpose.msra.mxu0 %v507_v14 }
  0x7b   : > { %794 = vmatmul.mubr.msk.bf16.vlgmr.msra.gmra.mrb[4].mxu0 %vm376_vm1, %v361_v11 }
 0x13e   : > { %v420_v15 = vpop.f32.mrb[0].mxu0  ;;  %v482_v19 = vpop.f32.mrb[0].mxu1 }
 0x13f   : > { %v426_v16 = vmul.f32 0.17677669, %v420_v15  ;;  %v779_v17 = vpop.f32.mrb[1].mxu0  ;;  %488 = vst.msk [vmem:[%s351_s18] sm:$0xff] %vm376_vm1, %v482_v19  ;;  %v787_v21 = vpop.f32.mrb[1].mxu1 }
 0x140   : > { %v423_v18 = vpop.f32.mrb[2].mxu0  ;;  %v485_v22 = vpop.f32.mrb[2].mxu1 }
 0x141   : > { %427 = vst.msk [vmem:[%s344_s20] sm:$0xff] %vm376_vm1, %v426_v16  ;;  %v780_v20 = vpop.f32.mrb[3].mxu0  ;;  %v788_v23 = vpop.f32.mrb[3].mxu1 }
 0x14e   : > { %v543_v24 = vpop.f32.mrb[4].mxu0 }
 0x14f   : > { %549 = vst.msk [vmem:[%s358_s8] sm:$0xff] %vm376_vm1, %v543_v24  ;;  %v795_v25 = vpop.f32.mrb[5].mxu0 }
 0x150   : > { %v546_v26 = vpop.f32.mrb[6].mxu0 }
 0x151   : > { %v796_v27 = vpop.f32.mrb[7].mxu0 }
 0x152 PF: > { %s19_s23 = sadd.s32 1, %s976_s23   ;;  %s1210_s21 = smov %s972_s22 }
 0x153   : > { %p16_p2 = scmp.ge.s32.totalorder %s19_s23, 4   ;;  %s1211_s22 = smov %s1213_s30 }
 0x155   :  { %18 = sbr.rel (!%p16_p2) target bundleno = 3 (0x3), region = 103 }
 0x15c   :  { %615 = vsyncpa [#allocation3], 1 }
 0x15d   :  { %617 = vsyncpa [#allocation3 + $0x1], 1 }
 0x15e   :  { %618 = vsyncpa [#allocation5], 1 }

// kernel: multi_head_attention.5
= control target key start
LH: loop header
LB: loop body
LE: loop exit
PB: predicated region body
PF: predicated region fallthrough
CT: control target
= control target key end

     0   :  { %9 = vsyncpa [#allocation3], 0  ;;  %s771_s0 = inlined_call_operand.vmem [shape: f32[2,8,32], index: 0, kind: input, shape index: {}]   ;;  %s772_s1 = inlined_call_operand.vmem [shape: f32[2,8,32], index: 1, kind: input, shape index: {}]   ;;  %s773_s2 = inlined_call_operand.vmem [shape: bf16[32,32], index: 2, kind: input, shape index: {}]   ;;  %s774_s3 = inlined_call_operand.vmem [shape: f32[3,32], index: 3, kind: input, shape index: {}]   ;;  %s775_s4 = inlined_call_operand.hbm [shape: f32[2,8,32], index: 4, kind: output, shape index: {}]  }
   0x1   :  { %11 = vsyncpa [#allocation3 + $0x1], 0  ;;  %s641_s15 = smov 0   ;;  %s643_s16 = smov 0  }
   0x2   :  { %s645_s17 = smov 0   ;;  %s647_s18 = smov 0  }
   0x3   :  { %s649_s19 = smov 0   ;;  %s651_s20 = smov 0  }
   0x4 LB: > { %s446_s21 = sadd.s32 4294967295, %s611_s20   ;;  %s447_s22 = sadd.s32 4294967294, %s611_s20   ;;  %s611_s20 = sphi %s651_s20, %s17_s20   ;;  %s607_s19 = sphi %s649_s19, %s782_s19   ;;  %s603_s18 = sphi %s647_s18, %s781_s18   ;;  %s599_s17 = sphi %s645_s17, %s780_s17   ;;  %s595_s16 = sphi %s643_s16, %s779_s16   ;;  %s591_s15 = sphi %s641_s15, %s778_s15  }
   0x5   : > { %s29_s23 = sadd.s32 1, %s607_s19  ;;  %s136_s24 = sadd.s32 1, %s599_s17 }
   0x6   : > { %p31_p0 = scmp.ge.s32.totalorder %s29_s23, 2  ;;  %p146_p1 = scmp.ne.s32.totalorder %s599_s17, %s595_s16 }
   0x7   : > { %p147_p2 = scmp.eq.s32.totalorder %s446_s21, 1  ;;  %p152_p3 = scmp.ne.s32.totalorder %s595_s16, %s591_s15 }
   0x8   : > { %s784_s23 = smov (%p31_p0, %s29_s23), 0  ;;  %p153_p5 = scmp.eq.s32.totalorder %s447_s22, 1 }
   0x9   : > { %p681_p4 = por %p147_p2, %p146_p1  ;;  %s131_s26 = ssub.s32 %s607_s19, %s784_s23 }
   0xa   : > { %p450_p6 = scmp.ge.s32.totalorder %s611_s20, 1  ;;  %p134_p7 = scmp.eq.s32.totalorder %s131_s26, 0 }
   0xb   : > { %p688_p8 = por %p153_p5, %p152_p3  ;;  %p197_p9 = scmp.lt.s32.totalorder %s611_s20, 3 }
   0xc   : > { %s694_s28 = scalar_select %p134_p7, %s599_s17, %s136_s24  }
   0xd   : > { %p198_p10 = pnand %p450_p6, %p197_p9 }
   0xe   : > { %v529_v0 = vld [vmem:[%s773_s2] sm:$0xff] (!%p198_p10)   ;;  %v613_v1 = vmov (!%p198_p10), 0.0   ;;  %vm268_vm0 = vcmask (!%p198_p10), 261120   ;;  %p232_p11 = scmp.lt.s32.totalorder (!%p198_p10), %s603_s18, 1  ;;  %vm614_vm1 = vmmov (!%p198_p10), 0   ;;  %v530_v3 = vld [vmem:[%s773_s2 + $0x8] sm:$0xff] (!%p198_p10)   ;;  %v254_v7 = vlaneseq (!%p198_p10) }
   0xf   : > { %201 = sbr.rel (%p198_p10) target bundleno = 574 (0x23e), region = 36  ;;  %464 = vmatprep.subr.bf16.mxu0 (!%p198_p10), %v613_v1  ;;  %v273_v2 = vsel (!%p198_p10), %vm268_vm0, %v529_v0, 0  ;;  %468 = vmatprep.mubr.msk.bf16.mxu0 (!%p198_p10), %vm614_vm1, %v613_v1  ;;  %v276_v4 = vsel (!%p198_p10), %vm268_vm0, %v530_v3, 0  ;;  %v253_v10 = vld [vmem:[%s774_s3] sm:$0x7] (!%p198_p10)  ;;  %s229_s24 = sand.u32 (!%p198_p10), 1, %s595_s16  }
  0x10   : > { %465 = vmatpush3.bf16.xpose.msra.mxu0 (!%p198_p10), %v273_v2  ;;  %v255_v8 = vshrl.u32 (!%p198_p10), %v254_v7, 7  ;;  %s451_s26 = sshll.u32 (!%p198_p10), %s229_s24, 3  ;;  %s458_s29 = sshll.u32 (!%p198_p10), %s603_s18, 7 }
  0x11   : > { %466 = vmatprep.subr.bf16.mxu0 (!%p198_p10), %v613_v1  ;;  %s231_s30 = scalar_lea.vmem (!%p198_p10), [#allocation2], %s451_s26  ;;  %s346_s9 = scalar_lea.sflag (!%p198_p10), [#allocation3], %s229_s24 }
  0x12   : > { %v256_v9 = vsub.s32 (!%p198_p10), 0, %v255_v8  ;;  %v336_v28 = vsub.s32 (!%p198_p10), 1, %v255_v8  ;;  %v341_v29 = vsub.s32 (!%p198_p10), 2, %v255_v8  ;;  %s360_s5 = sshll.u32 (!%p198_p10), %s231_s30, 4  ;;  %s725_s5 = int_to_ptr.vmem [resolvable:$true] %s360_s5 }
  0x13   : > { %s533_s10 = scalar_lea.vmem (!%p198_p10), %s725_s5, 128 }
  0x14   : > { %v257_v11 = vrot.slane (!%p198_p10), %v253_v10, %v256_v9  ;;  %v337_v30 = vrot.slane (!%p198_p10), %v253_v10, %v336_v28  ;;  %v342_v32 = vrot.slane (!%p198_p10), %v253_v10, %v341_v29  ;;  %p534_p12 = scmp.ne.s32.totalorder (!%p198_p10), %s725_s5, %s533_s10 }
  0x16   : > { %s233_s7 = scalar_select %p232_p11, %s603_s18, 1 }
  0x17   : > { %p535_p13 = pnand %p534_p12, %p681_p4  ;;  %s615_s18 = smov [#allocation2]  }
  0x18   : > { %s452_s8 = sshll.u32 %s233_s7, 3  ;;  %467 = vmatpush3.bf16.xpose.msra.mxu0 %v276_v4 }
  0x19   : > { %s238_s11 = scalar_lea.vmem %s771_s0, %s452_s8  ;;  %s245_s22 = scalar_lea.vmem %s772_s1, %s452_s8 }
  0x1a   : > { %v247_v5 = vld [vmem:[%s238_s11] sm:$0xff]  ;;  %s723_s8 = scalar_lea.hbm %s775_s4, %s458_s29  ;;  %p536_p0 = pneg %p535_p13 }
  0x1b   : > { %v248_v6 = vpack.c.bf16 %v247_v5, %v247_v5  ;;  %v318_v13 = vld [vmem:[%s245_s22] sm:$0xff]  ;;  %s537_s11 = sshll.u32 %s615_s18, 4  ;;  %s538_s11 = int_to_ptr.vmem [resolvable:$false] %s537_s11 }
  0x1c   : > { %s539_s12 = scalar_lea.vmem %s538_s11, 256  ;;  %p540_p1 = scmp.lt.s32.totalorder %s725_s5, %s538_s11 }
  0x1d   : > { %p541_p2 = scmp.lt.s32.totalorder %s539_s12, %s533_s10 }
  0x1f   : > { %469 = vmatmul.mubr.msk.bf16.vlgmr.msra.gmra.mrb[0].mxu0 %vm268_vm0, %v248_v6  ;;  %p542_p3 = por %p541_p2, %p540_p1 }
  0x21   : > { %p543_p5 = pnand %p542_p3, %p536_p0 }
  0xf2   : > { %v312_v12 = vpop.f32.mrb[0].mxu0 }
  0xf3   : > { %v313_v14 = vadd.f32 %v312_v12, %v257_v11  ;;  %v470_v15 = vpop.f32.mrb[1].mxu0 }
  0xf4   : > { %v315_v16 = vpop.f32.mrb[2].mxu0 }
  0xf5   : > { %v471_v17 = vpop.f32.mrb[3].mxu0  ;;  %v319_v18 = vadd.f32 %v318_v13, %v313_v14 }
  0xf7   : > { %v320_v19 = vsel %vm268_vm0, %v319_v18, 0.0 }
  0xf8   : > { %321 = vadd.xlane.f32.xlu0 %v320_v19 }
 0x185   : > { %v322_v20 = vpop.xlane.xlu0 %321 }
 0x186   : > { %v324_v21 = vmul.f32 0.03125, %v322_v20 }
 0x188   : > { %v325_v22 = vsub.f32 %v319_v18, %v324_v21 }
 0x18a   : > { %v326_v23 = vmul.f32 %v325_v22, %v325_v22 }
 0x18c   : > { %v327_v24 = vsel %vm268_vm0, %v326_v23, 0.0 }
 0x18d   : > { %328 = vadd.xlane.f32.xlu0 %v327_v24 }
 0x21a   : > { %v329_v25 = vpop.xlane.xlu0 %328 }
 0x21b   : > { %v330_v26 = vmul.f32 0.03125, %v329_v25 }
 0x21d   : > { %v331_v27 = vadd.f32 1e-05, %v330_v26 }
 0x21f   : > { %531 = vrsqrt.f32 %v331_v27 }
 0x229   : > { %v532_v31 = vpop.eup %531 }
 0x22a   : > { %v333_v33 = vmul.f32 %v532_v31, %v325_v22 }
 0x22c   : > { %v338_v34 = vmul.f32 %v337_v30, %v333_v33 }
 0x22e   : > { %v343_v35 = vadd.f32 %v342_v32, %v338_v34 }
 0x230   : > { %344 = vst.msk [vmem:[%s231_s30] sm:$0xff] %vm268_vm0, %v343_v35 }
 0x231   : > { %546 = shalt.err (!%p543_p5)
}
 0x232   : > { %s547_s13 = scalar_lea.hbm %s723_s8, 128  ;;  %s551_s22 = scalar_lea.hbm %s775_s4, 256 }
 0x233   : > { %p548_p6 = scmp.ne.s32.totalorder %s723_s8, %s547_s13  ;;  %p552_p10 = scmp.lt.u32.totalorder %s723_s8, %s775_s4 }
 0x234   : > { %p553_p11 = scmp.lt.u32.totalorder %s551_s22, %s547_s13  ;;  %p555_p13 = scmp.lt.u32.totalorder %s547_s13, %s723_s8 }
 0x235   : > { %p549_p7 = pnand %p548_p6, %p681_p4 }
 0x236   : > { %p554_p12 = por %p553_p11, %p552_p10 }
 0x237   : > { %p550_p9 = pneg %p549_p7 }
 0x238   : > { %p556_p0 = por %p555_p13, %p554_p12 }
 0x23a   : > { %p557_p1 = pnand %p556_p0, %p550_p9 }
 0x23c   : > { %560 = shalt.err (!%p557_p1)
}
 0x23d   : > { %472 = dma.vmem_to_hbm [thread:$0]  (%p681_p4), %s725_s5, 128, %s723_s8, %s346_s9  }
 0x23e PF: > { %p478_p2 = scmp.ge.s32.totalorder %s611_s20, 2  ;;  %s372_s29 = sand.u32 1, %s591_s15  }
 0x23f   : > { %s373_s30 = scalar_lea.sflag [#allocation3], %s372_s29 }
 0x240   : > { %p475_p3 = pnand %p478_p2, %p688_p8 }
 0x242   : > { %586 = dma.done.wait (!%p475_p3), %s373_s30, 128  }
 0x243   : > { %588 = vsyncadd (!%p475_p3), %s373_s30, 4294967168  ;;  %s17_s20 = sadd.s32 1, %s611_s20   ;;  %s778_s15 = smov %s595_s16 }
 0x244   : > { %p14_p5 = scmp.ge.s32.totalorder %s17_s20, 4   ;;  %s779_s16 = smov %s599_s17 }
 0x245   : > { %s780_s17 = smov %s694_s28  ;;  %s781_s18 = smov %s607_s19 }
 0x246   : > { %s782_s19 = smov %s784_s23  ;;  %16 = sbr.rel (!%p14_p5) target bundleno = 4 (0x4), region = 74 }
 0x24d   :  { %378 = vsyncpa [#allocation3], 1 }
 0x24e   :  { %380 = vsyncpa [#allocation3 + $0x1], 1 }

// kernel: multi_head_attention.4
= control target key start
LH: loop header
LB: loop body
LE: loop exit
PB: predicated region body
PF: predicated region fallthrough
CT: control target
= control target key end

     0   :  { %s1848_s12 = smov 0   ;;  %s1850_s13 = smov 0   ;;  %s2238_s0 = inlined_call_operand.vmem [shape: f32[16,8,4], index: 0, kind: input, shape index: {}]   ;;  %s2239_s1 = inlined_call_operand.vmem [shape: f32[16,8,4], index: 1, kind: input, shape index: {}]   ;;  %s2240_s2 = inlined_call_operand.vmem [shape: f32[16,8,4], index: 2, kind: input, shape index: {}]   ;;  %s2241_s3 = inlined_call_operand.vmem [shape: f32[16,8,4], index: 3, kind: output, shape index: {}]  }
   0x1   :  { %s1852_s14 = smov 0  }
   0x2 LB: > { %s32_s15 = sadd.s32 1, %s1818_s13  ;;  %p1567_p0 = scmp.ge.s32.totalorder %s1822_s14, 1  ;;  %s1822_s14 = sphi %s1852_s14, %s13_s14   ;;  %s1818_s13 = sphi %s1850_s13, %s2243_s13   ;;  %s1814_s12 = sphi %s1848_s12, %s2242_s12  }
   0x3   : > { %p34_p1 = scmp.ge.s32.totalorder %s32_s15, 2  ;;  %p196_p2 = scmp.lt.s32.totalorder %s1822_s14, 3 }
   0x5   : > { %s2245_s15 = smov (%p34_p1, %s32_s15), 0  ;;  %p197_p3 = pnand %p1567_p0, %p196_p2 }
   0x6   : > { %s1568_s16 = sshll.u32 (!%p197_p3), %s1814_s12, 3  ;;  %vm300_vm0 = vcmask (!%p197_p3), 31744   ;;  %v1824_v0 = vmov (!%p197_p3), 0.0   ;;  %vm1825_vm1 = vmmov (!%p197_p3), 0   ;;  %vm283_vm2 = vcmask (!%p197_p3), 7168  }
   0x7   : > { %200 = sbr.rel (%p197_p3) target bundleno = 851 (0x353), region = 32  ;;  %1626 = vmatprep.subr.bf16.mxu0 (!%p197_p3), %v1824_v0  ;;  %p243_p4 = scmp.lt.s32.totalorder (!%p197_p3), %s1568_s16, 15  ;;  %301 = vst.msk [vmem:[#allocation4] sm:$0xff] (!%p197_p3), %vm300_vm0, %v1824_v0  ;;  %302 = vst.msk [vmem:[#allocation4 + $0x8] sm:$0xff] (!%p197_p3), %vm300_vm0, %v1824_v0  ;;  %1632 = vmatprep.subr.bf16.mxu1 (!%p197_p3), %v1824_v0  ;;  %v1826_v41 = vmov (!%p197_p3), -inf   ;;  %vm734_vm3 = vcmask (!%p197_p3), 64512  }
   0x8   : > { %303 = vst.msk [vmem:[#allocation4 + $0x10] sm:$0xff] (!%p197_p3), %vm300_vm0, %v1824_v0  ;;  %304 = vst.msk [vmem:[#allocation4 + $0x18] sm:$0xff] (!%p197_p3), %vm300_vm0, %v1824_v0  ;;  %1628 = vmatprep.mubr.msk.bf16.mxu0 (!%p197_p3), %vm1825_vm1, %v1824_v0  ;;  %1634 = vmatprep.mubr.msk.bf16.mxu1 (!%p197_p3), %vm1825_vm1, %v1824_v0  ;;  %vm979_vm4 = vcmask (!%p197_p3), 1043456  }
   0x9   : > { %305 = vst.msk [vmem:[#allocation4 + $0x20] sm:$0xff] (!%p197_p3), %vm300_vm0, %v1824_v0  ;;  %306 = vst.msk [vmem:[#allocation4 + $0x28] sm:$0xff] (!%p197_p3), %vm300_vm0, %v1824_v0 }
   0xa   : > { %307 = vst.msk [vmem:[#allocation4 + $0x30] sm:$0xff] (!%p197_p3), %vm300_vm0, %v1824_v0  ;;  %308 = vst.msk [vmem:[#allocation4 + $0x38] sm:$0xff] (!%p197_p3), %vm300_vm0, %v1824_v0 }
   0xb   : > { %284 = vst.msk [vmem:[#allocation2] sm:$0xff] (!%p197_p3), %vm283_vm2, %v1826_v41  ;;  %285 = vst.msk [vmem:[#allocation2 + $0x8] sm:$0xff] (!%p197_p3), %vm283_vm2, %v1826_v41 }
   0xc   : > { %286 = vst.msk [vmem:[#allocation2 + $0x10] sm:$0xff] (!%p197_p3), %vm283_vm2, %v1826_v41  ;;  %287 = vst.msk [vmem:[#allocation2 + $0x18] sm:$0xff] (!%p197_p3), %vm283_vm2, %v1826_v41 }
   0xd   : > { %288 = vst.msk [vmem:[#allocation2 + $0x20] sm:$0xff] (!%p197_p3), %vm283_vm2, %v1826_v41  ;;  %289 = vst.msk [vmem:[#allocation2 + $0x28] sm:$0xff] (!%p197_p3), %vm283_vm2, %v1826_v41 }
   0xe   : > { %s2247_s16 = smov (!%p243_p4, %s1568_s16), 15  ;;  %290 = vst.msk [vmem:[#allocation2 + $0x30] sm:$0xff] %vm283_vm2, %v1826_v41  ;;  %291 = vst.msk [vmem:[#allocation2 + $0x38] sm:$0xff] %vm283_vm2, %v1826_v41 }
   0xf   : > { %s1888_s17 = sshll.u32 %s2247_s16, 3  ;;  %292 = vst.msk [vmem:[#allocation3] sm:$0xff] %vm283_vm2, %v1824_v0  ;;  %293 = vst.msk [vmem:[#allocation3 + $0x8] sm:$0xff] %vm283_vm2, %v1824_v0 }
  0x10   : > { %s1894_s20 = scalar_lea.vmem %s2239_s1, %s1888_s17  ;;  %s1902_s23 = scalar_lea.vmem %s2238_s0, %s1888_s17  ;;  %294 = vst.msk [vmem:[#allocation3 + $0x10] sm:$0xff] %vm283_vm2, %v1824_v0  ;;  %295 = vst.msk [vmem:[#allocation3 + $0x18] sm:$0xff] %vm283_vm2, %v1824_v0 }
  0x11   : > { %v325_v1 = vld [vmem:[%s1894_s20] sm:$0xff]  ;;  %v326_v2 = vld [vmem:[%s1894_s20 + $0x8] sm:$0xff]  ;;  %v327_v5 = vld [vmem:[%s1894_s20 + $0x10] sm:$0xff]  ;;  %296 = vst.msk [vmem:[#allocation3 + $0x20] sm:$0xff] %vm283_vm2, %v1824_v0  ;;  %s2050_s26 = scalar_lea.vmem %s2240_s2, %s1888_s17  ;;  %s2211_s29 = scalar_lea.vmem %s2241_s3, %s1888_s17 }
  0x12   : > { %v333_v3 = vpack.c.bf16 %v325_v1, %v325_v1  ;;  %v334_v4 = vpack.c.bf16 %v326_v2, %v326_v2  ;;  %v328_v6 = vld [vmem:[%s1894_s20 + $0x18] sm:$0xff]  ;;  %v309_v9 = vld [vmem:[%s1902_s23] sm:$0xff]  ;;  %v310_v10 = vld [vmem:[%s1902_s23 + $0x8] sm:$0xff]  ;;  %v335_v11 = vpack.c.bf16 %v327_v5, %v327_v5  ;;  %297 = vst.msk [vmem:[#allocation3 + $0x28] sm:$0xff] %vm283_vm2, %v1824_v0  ;;  %v1827_v5 = vmov 0  }
  0x13   : > { %v336_v12 = vpack.c.bf16 %v328_v6, %v328_v6  ;;  %v317_v13 = vpack.c.bf16 %v309_v9, %v309_v9  ;;  %v318_v14 = vpack.c.bf16 %v310_v10, %v310_v10  ;;  %v329_v17 = vld [vmem:[%s1894_s20 + $0x20] sm:$0xff]  ;;  %v330_v18 = vld [vmem:[%s1894_s20 + $0x28] sm:$0xff]  ;;  %v311_v19 = vld [vmem:[%s1902_s23 + $0x10] sm:$0xff]  ;;  %298 = vst.msk [vmem:[#allocation3 + $0x30] sm:$0xff] %vm283_vm2, %v1824_v0  ;;  %1750 = vset.pattern.permute.xlu0 %v1827_v5 }
  0x14   : > { %v362_v7 = vsel %vm300_vm0, %v333_v3, 0  ;;  %v408_v8 = vsel %vm300_vm0, %v334_v4, 0  ;;  %v454_v15 = vsel %vm300_vm0, %v335_v11, 0  ;;  %v312_v20 = vld [vmem:[%s1902_s23 + $0x18] sm:$0xff]  ;;  %v337_v21 = vpack.c.bf16 %v329_v17, %v329_v17  ;;  %v331_v27 = vld [vmem:[%s1894_s20 + $0x30] sm:$0xff]  ;;  %v313_v29 = vld [vmem:[%s1902_s23 + $0x20] sm:$0xff]  ;;  %1751 = vset.pattern.permute.xlu1 %v1827_v5 }
  0x15   : > { %1627 = vmatpush3.bf16.xpose.msra.mxu0 %v362_v7  ;;  %1633 = vmatpush3.bf16.xpose.msra.mxu1 %v408_v8  ;;  %v500_v16 = vsel %vm300_vm0, %v336_v12, 0  ;;  %v338_v22 = vpack.c.bf16 %v330_v18, %v330_v18  ;;  %v319_v23 = vpack.c.bf16 %v311_v19, %v311_v19  ;;  %v320_v24 = vpack.c.bf16 %v312_v20, %v312_v20  ;;  %v332_v28 = vld [vmem:[%s1894_s20 + $0x38] sm:$0xff]  ;;  %v314_v30 = vld [vmem:[%s1902_s23 + $0x28] sm:$0xff]  ;;  %v315_v37 = vld [vmem:[%s1902_s23 + $0x30] sm:$0xff] }
  0x16   : > { %1638 = vmatprep.subr.bf16.mxu0 %v1824_v0  ;;  %1644 = vmatprep.subr.bf16.mxu1 %v1824_v0  ;;  %v546_v25 = vsel %vm300_vm0, %v337_v21, 0  ;;  %v339_v31 = vpack.c.bf16 %v331_v27, %v331_v27  ;;  %v340_v32 = vpack.c.bf16 %v332_v28, %v332_v28  ;;  %v321_v33 = vpack.c.bf16 %v313_v29, %v313_v29  ;;  %v316_v38 = vld [vmem:[%s1902_s23 + $0x38] sm:$0xff]  ;;  %v2014_v20 = vld [vmem:[#allocation2] sm:$0xff]  ;;  %v2029_v27 = vld [vmem:[#allocation2 + $0x10] sm:$0xff] }
  0x17   : > { %v592_v26 = vsel %vm300_vm0, %v338_v22, 0  ;;  %v322_v34 = vpack.c.bf16 %v314_v30, %v314_v30  ;;  %v323_v39 = vpack.c.bf16 %v315_v37, %v315_v37  ;;  %v324_v40 = vpack.c.bf16 %v316_v38, %v316_v38  ;;  %299 = vst.msk [vmem:[#allocation3 + $0x38] sm:$0xff] %vm283_vm2, %v1824_v0  ;;  %v2058_v37 = vld [vmem:[#allocation2 + $0x28] sm:$0xff] }
  0x18   : > { %v638_v35 = vsel %vm300_vm0, %v339_v31, 0  ;;  %v684_v36 = vsel %vm300_vm0, %v340_v32, 0  ;;  %v2039_v31 = vld [vmem:[#allocation2 + $0x18] sm:$0xff] }
  0x1c   : > { %1629 = vmatmul.mubr.msk.bf16.vlgmr.msra.gmra.mrb[0].mxu0 %vm300_vm0, %v317_v13  ;;  %1635 = vmatmul.mubr.msk.bf16.vlgmr.msra.gmra.mrb[0].mxu1 %vm300_vm0, %v318_v14 }
  0x1d   : > { %1639 = vmatpush3.bf16.xpose.msra.mxu0 %v454_v15  ;;  %1645 = vmatpush3.bf16.xpose.msra.mxu1 %v500_v16 }
  0x1e   : > { %1640 = vmatprep.mubr.msk.bf16.mxu0 %vm1825_vm1, %v1824_v0  ;;  %1650 = vmatprep.subr.bf16.mxu0 %v1824_v0 }
  0x1f   : > { %1646 = vmatprep.mubr.msk.bf16.mxu1 %vm1825_vm1, %v1824_v0  ;;  %1656 = vmatprep.subr.bf16.mxu1 %v1824_v0 }
  0x24   : > { %1641 = vmatmul.mubr.msk.bf16.vlgmr.msra.gmra.mrb[4].mxu0 %vm300_vm0, %v319_v23  ;;  %1647 = vmatmul.mubr.msk.bf16.vlgmr.msra.gmra.mrb[4].mxu1 %vm300_vm0, %v320_v24  ;;  %v2019_v23 = vld [vmem:[#allocation2 + $0x8] sm:$0xff] }
  0x25   : > { %1651 = vmatpush3.bf16.xpose.msra.mxu0 %v546_v25  ;;  %1657 = vmatpush3.bf16.xpose.msra.mxu1 %v592_v26 }
  0x26   : > { %1652 = vmatprep.mubr.msk.bf16.mxu0 %vm1825_vm1, %v1824_v0  ;;  %1662 = vmatprep.subr.bf16.mxu0 %v1824_v0 }
  0x27   : > { %1658 = vmatprep.mubr.msk.bf16.mxu1 %vm1825_vm1, %v1824_v0  ;;  %1668 = vmatprep.subr.bf16.mxu1 %v1824_v0 }
  0x2c   : > { %1653 = vmatmul.mubr.msk.bf16.vlgmr.msra.gmra.mrb[8].mxu0 %vm300_vm0, %v321_v33  ;;  %1659 = vmatmul.mubr.msk.bf16.vlgmr.msra.gmra.mrb[8].mxu1 %vm300_vm0, %v322_v34 }
  0x2d   : > { %1663 = vmatpush3.bf16.xpose.msra.mxu0 %v638_v35  ;;  %1669 = vmatpush3.bf16.xpose.msra.mxu1 %v684_v36  ;;  %v341_v35 = vld [vmem:[%s2050_s26] sm:$0xff]  ;;  %v2056_v36 = vld [vmem:[#allocation2 + $0x20] sm:$0xff] }
  0x2e   : > { %1664 = vmatprep.mubr.msk.bf16.mxu0 %vm1825_vm1, %v1824_v0  ;;  %1670 = vmatprep.mubr.msk.bf16.mxu1 %vm1825_vm1, %v1824_v0  ;;  %v349_v38 = vpack.c.bf16 %v341_v35, %v341_v35 }
  0x2f   : > { %1674 = vmatprep.subr.bf16.mxu0 %v1824_v0  ;;  %1680 = vmatprep.subr.bf16.mxu1 %v1824_v0 }
  0x34   : > { %1665 = vmatmul.mubr.msk.bf16.vlgmr.msra.gmra.mrb[12].mxu0 %vm300_vm0, %v323_v39  ;;  %1671 = vmatmul.mubr.msk.bf16.vlgmr.msra.gmra.mrb[12].mxu1 %vm300_vm0, %v324_v40 }
  0x35   : > { %1676 = vmatprep.mubr.msk.bf16.mxu0 %vm1825_vm1, %v1824_v0  ;;  %1682 = vmatprep.mubr.msk.bf16.mxu1 %vm1825_vm1, %v1824_v0 }
  0xef   : > { %v1982_v42 = vpop.f32.mrb[0].mxu0  ;;  %v1984_v43 = vpop.f32.mrb[0].mxu1 }
  0xf0   : > { %v1630_v44 = vpop.f32.mrb[1].mxu0  ;;  %v735_v45 = vsel %vm734_vm3, %v1982_v42, -inf  ;;  %v1636_v46 = vpop.f32.mrb[1].mxu1  ;;  %v738_v51 = vsel %vm734_vm3, %v1984_v43, -inf }
  0xf1   : > { %736 = vmax.xlane.f32.xlu0 %v735_v45  ;;  %v401_v47 = vpop.f32.mrb[2].mxu0  ;;  %v447_v48 = vpop.f32.mrb[2].mxu1  ;;  %v981_v44 = vsel %vm979_vm4, %v349_v38, 0 }
  0xf2   : > { %v1631_v49 = vpop.f32.mrb[3].mxu0  ;;  %v1637_v50 = vpop.f32.mrb[3].mxu1  ;;  %1675 = vmatpush3.bf16.msra.mxu0 %v981_v44  ;;  %v342_v47 = vld [vmem:[%s2050_s26 + $0x8] sm:$0xff] }
  0xf3   : > { %v350_v48 = vpack.c.bf16 %v342_v47, %v342_v47  ;;  %1686 = vmatprep.subr.bf16.mxu0 %v1824_v0 }
  0xf5   : > { %739 = vmax.xlane.f32.xlu0 %v738_v51  ;;  %v1027_v51 = vsel %vm979_vm4, %v350_v48, 0 }
  0xf6   : > { %1681 = vmatpush3.bf16.msra.mxu1 %v1027_v51 }
  0xf7   : > { %v1990_v52 = vpop.f32.mrb[4].mxu0  ;;  %v1992_v53 = vpop.f32.mrb[4].mxu1  ;;  %1692 = vmatprep.subr.bf16.mxu1 %v1824_v0 }
  0xf8   : > { %v1642_v54 = vpop.f32.mrb[5].mxu0  ;;  %v741_v55 = vsel %vm734_vm3, %v1990_v52, -inf  ;;  %v1648_v56 = vpop.f32.mrb[5].mxu1  ;;  %v744_v61 = vsel %vm734_vm3, %v1992_v53, -inf }
  0xf9   : > { %742 = vmax.xlane.f32.xlu1 %v741_v55  ;;  %v493_v57 = vpop.f32.mrb[6].mxu0  ;;  %v539_v58 = vpop.f32.mrb[6].mxu1  ;;  %v343_v54 = vld [vmem:[%s2050_s26 + $0x10] sm:$0xff]  ;;  %v2085_v55 = vld [vmem:[#allocation2 + $0x30] sm:$0xff]  ;;  %v2087_v56 = vld [vmem:[#allocation2 + $0x38] sm:$0xff] }
  0xfa   : > { %v1643_v59 = vpop.f32.mrb[7].mxu0  ;;  %v1649_v60 = vpop.f32.mrb[7].mxu1  ;;  %v351_v57 = vpack.c.bf16 %v343_v54, %v343_v54 }
  0xfc   : > { %v1073_v60 = vsel %vm979_vm4, %v351_v57, 0 }
  0xfd   : > { %745 = vmax.xlane.f32.xlu1 %v744_v61 }
  0xff   : > { %v1998_v62 = vpop.f32.mrb[8].mxu0  ;;  %v2000_v63 = vpop.f32.mrb[8].mxu1 }
 0x100   : > { %v1654_v1 = vpop.f32.mrb[9].mxu0  ;;  %v747_v2 = vsel %vm734_vm3, %v1998_v62, -inf  ;;  %v1660_v3 = vpop.f32.mrb[9].mxu1  ;;  %v750_v4 = vsel %vm734_vm3, %v2000_v63, -inf }
 0x101   : > { %748 = vmax.xlane.f32.xlu0 %v747_v2  ;;  %v585_v6 = vpop.f32.mrb[10].mxu0  ;;  %v631_v7 = vpop.f32.mrb[10].mxu1  ;;  %751 = vmax.xlane.f32.xlu1 %v750_v4  ;;  %v344_v2 = vld [vmem:[%s2050_s26 + $0x18] sm:$0xff] }
 0x102   : > { %v1655_v8 = vpop.f32.mrb[11].mxu0  ;;  %v1661_v9 = vpop.f32.mrb[11].mxu1  ;;  %v352_v3 = vpack.c.bf16 %v344_v2, %v344_v2  ;;  %v345_v7 = vld [vmem:[%s2050_s26 + $0x20] sm:$0xff] }
 0x103   : > { %v353_v8 = vpack.c.bf16 %v345_v7, %v345_v7 }
 0x104   : > { %v1119_v6 = vsel %vm979_vm4, %v352_v3, 0 }
 0x105   : > { %v1165_v9 = vsel %vm979_vm4, %v353_v8, 0 }
 0x107   : > { %v2006_v10 = vpop.f32.mrb[12].mxu0  ;;  %v2008_v11 = vpop.f32.mrb[12].mxu1 }
 0x108   : > { %v1666_v12 = vpop.f32.mrb[13].mxu0  ;;  %v753_v13 = vsel %vm734_vm3, %v2006_v10, -inf  ;;  %v1672_v14 = vpop.f32.mrb[13].mxu1  ;;  %v756_v15 = vsel %vm734_vm3, %v2008_v11, -inf }
 0x109   : > { %754 = vmax.xlane.f32.xlu0 %v753_v13  ;;  %v677_v16 = vpop.f32.mrb[14].mxu0  ;;  %v723_v17 = vpop.f32.mrb[14].mxu1  ;;  %757 = vmax.xlane.f32.xlu1 %v756_v15  ;;  %v346_v12 = vld [vmem:[%s2050_s26 + $0x28] sm:$0xff]  ;;  %v347_v15 = vld [vmem:[%s2050_s26 + $0x30] sm:$0xff] }
 0x10a   : > { %v1667_v18 = vpop.f32.mrb[15].mxu0  ;;  %v1673_v19 = vpop.f32.mrb[15].mxu1  ;;  %v354_v13 = vpack.c.bf16 %v346_v12, %v346_v12  ;;  %v355_v16 = vpack.c.bf16 %v347_v15, %v347_v15 }
 0x10b   : > { %v348_v18 = vld [vmem:[%s2050_s26 + $0x38] sm:$0xff] }
 0x10c   : > { %v2114_v14 = vsel %vm979_vm4, %v354_v13, 0  ;;  %v2118_v17 = vsel %vm979_vm4, %v355_v16, 0  ;;  %v356_v19 = vpack.c.bf16 %v348_v18, %v348_v18 }
 0x17e   : > { %v737_v21 = vpop.xlane.xlu0 %736 }
 0x17f   : > { %v2017_v22 = vmax.f32 %v2014_v20, %v737_v21  ;;  %v2122_v21 = vsel %vm979_vm4, %v356_v19, 0 }
 0x181   : > { %v767_v24 = vsub.f32 %v2014_v20, %v2017_v22  ;;  %1361 = vst.msk [vmem:[#allocation2] sm:$0xff] %vm283_vm2, %v2017_v22  ;;  %793 = vperm.xlu0 %1750, %v2017_v22  }
 0x182   : > { %v740_v25 = vpop.xlane.xlu0 %739 }
 0x183   : > { %v2027_v26 = vmax.f32 %v2019_v23, %v740_v25 }
 0x185   : > { %v768_v28 = vsub.f32 %v2019_v23, %v2027_v26  ;;  %1362 = vst.msk [vmem:[#allocation2 + $0x8] sm:$0xff] %vm283_vm2, %v2027_v26  ;;  %798 = vperm.xlu1 %1751, %v2027_v26  }
 0x186   : > { %v743_v29 = vpop.xlane.xlu1 %742 }
 0x187   : > { %v2037_v30 = vmax.f32 %v2029_v27, %v743_v29 }
 0x189   : > { %v769_v32 = vsub.f32 %v2029_v27, %v2037_v30  ;;  %1363 = vst.msk [vmem:[#allocation2 + $0x10] sm:$0xff] %vm283_vm2, %v2037_v30  ;;  %803 = vperm.xlu1 %1751, %v2037_v30  }
 0x18a   : > { %v746_v33 = vpop.xlane.xlu1 %745 }
 0x18b   : > { %v2053_v34 = vmax.f32 %v2039_v31, %v746_v33 }
 0x18d   : > { %v770_v39 = vsub.f32 %v2039_v31, %v2053_v34  ;;  %1364 = vst.msk [vmem:[#allocation2 + $0x18] sm:$0xff] %vm283_vm2, %v2053_v34  ;;  %808 = vperm.xlu1 %1751, %v2053_v34  }
 0x18e   : > { %v749_v40 = vpop.xlane.xlu0 %748  ;;  %v752_v41 = vpop.xlane.xlu1 %751 }
 0x18f   : > { %v2067_v45 = vmax.f32 %v2056_v36, %v749_v40  ;;  %v2070_v46 = vmax.f32 %v2058_v37, %v752_v41 }
 0x191   : > { %v771_v49 = vsub.f32 %v2056_v36, %v2067_v45  ;;  %1365 = vst.msk [vmem:[#allocation2 + $0x20] sm:$0xff] %vm283_vm2, %v2067_v45  ;;  %813 = vperm.xlu1 %1751, %v2067_v45   ;;  %v772_v50 = vsub.f32 %v2058_v37, %v2070_v46  ;;  %1366 = vst.msk [vmem:[#allocation2 + $0x28] sm:$0xff] %vm283_vm2, %v2070_v46  ;;  %v855_v37 = vld [vmem:[#allocation3] sm:$0xff] }
 0x193   : > { %v783_v23 = vmul.f32 1.442695, %v771_v49  ;;  %v785_v20 = vmul.f32 1.442695, %v772_v50 }
 0x195   : > { %818 = vperm.xlu1 %1751, %v2070_v46   ;;  %v856_v46 = vld [vmem:[#allocation3 + $0x8] sm:$0xff] }
 0x196   : > { %v755_v58 = vpop.xlane.xlu0 %754  ;;  %v758_v59 = vpop.xlane.xlu1 %757 }
 0x197   : > { %v2093_v61 = vmax.f32 %v2085_v55, %v755_v58  ;;  %v2096_v1 = vmax.f32 %v2087_v56, %v758_v59 }
 0x199   : > { %v773_v4 = vsub.f32 %v2085_v55, %v2093_v61  ;;  %1367 = vst.msk [vmem:[#allocation2 + $0x30] sm:$0xff] %vm283_vm2, %v2093_v61  ;;  %823 = vperm.xlu1 %1751, %v2093_v61   ;;  %v774_v5 = vsub.f32 %v2087_v56, %v2096_v1  ;;  %1368 = vst.msk [vmem:[#allocation2 + $0x38] sm:$0xff] %vm283_vm2, %v2096_v1  ;;  %v857_v56 = vld [vmem:[#allocation3 + $0x10] sm:$0xff] }
 0x19b   : > { %v787_v22 = vmul.f32 1.442695, %v773_v4 }
 0x19d   : > { %828 = vperm.xlu1 %1751, %v2096_v1  }
 0x200   : > { %v794_v25 = vpop.permute.xlu0 %793 }
 0x201   : > { %v831_v29 = vsub.f32 %v1982_v42, %v794_v25 }
 0x203   : > { %v839_v33 = vmul.f32 1.442695, %v831_v29 }
 0x204   : > { %v799_v35 = vpop.permute.xlu1 %798 }
 0x205   : > { %1752 = vpow2.f32 %v839_v33  ;;  %v832_v38 = vsub.f32 %v1984_v43, %v799_v35 }
 0x207   : > { %v841_v40 = vmul.f32 1.442695, %v832_v38 }
 0x208   : > { %v804_v41 = vpop.permute.xlu1 %803 }
 0x209   : > { %1754 = vpow2.f32 %v841_v40  ;;  %v833_v44 = vsub.f32 %v1990_v52, %v804_v41 }
 0x20b   : > { %v843_v47 = vmul.f32 1.442695, %v833_v44 }
 0x20c   : > { %v809_v48 = vpop.permute.xlu1 %808 }
 0x20d   : > { %1756 = vpow2.f32 %v843_v47  ;;  %v834_v51 = vsub.f32 %v1992_v53, %v809_v48 }
 0x20f   : > { %v1753_v54 = vpop.eup %1752  ;;  %v845_v57 = vmul.f32 1.442695, %v834_v51  ;;  %v779_v51 = vmul.f32 1.442695, %v769_v32 }
 0x210   : > { %v814_v58 = vpop.permute.xlu1 %813  ;;  %v871_v42 = vsel %vm734_vm3, %v1753_v54, 0.0  ;;  %v968_v59 = vpack.c.bf16 %v1753_v54, %v1753_v54  ;;  %v781_v54 = vmul.f32 1.442695, %v770_v39 }
 0x211   : > { %1758 = vpow2.f32 %v845_v57  ;;  %v835_v2 = vsub.f32 %v1998_v62, %v814_v58  ;;  %872 = vadd.xlane.f32.xlu1 %v871_v42 }
 0x212   : > { %1677 = vmatmul.mubr.msk.bf16.vlgmr.msra.gmra.mrb[16].mxu0 %vm734_vm3, %v968_v59 }
 0x213   : > { %v1755_v43 = vpop.eup %1754  ;;  %v847_v3 = vmul.f32 1.442695, %v835_v2  ;;  %1687 = vmatpush3.bf16.msra.mxu0 %v1073_v60  ;;  %1688 = vmatprep.mubr.msk.bf16.mxu0 %vm1825_vm1, %v1824_v0  ;;  %v859_v2 = vld [vmem:[#allocation3 + $0x20] sm:$0xff] }
 0x214   : > { %v819_v52 = vpop.permute.xlu1 %818  ;;  %v874_v53 = vsel %vm734_vm3, %v1755_v43, 0.0  ;;  %v969_v7 = vpack.c.bf16 %v1755_v43, %v1755_v43  ;;  %1698 = vmatprep.subr.bf16.mxu0 %v1824_v0 }
 0x215   : > { %1760 = vpow2.f32 %v847_v3  ;;  %v836_v8 = vsub.f32 %v2000_v63, %v819_v52  ;;  %875 = vadd.xlane.f32.xlu0 %v874_v53 }
 0x216   : > { %1683 = vmatmul.mubr.msk.bf16.vlgmr.msra.gmra.mrb[16].mxu1 %vm734_vm3, %v969_v7  ;;  %v860_v7 = vld [vmem:[#allocation3 + $0x28] sm:$0xff] }
 0x217   : > { %v1757_v62 = vpop.eup %1756  ;;  %v849_v12 = vmul.f32 1.442695, %v836_v8  ;;  %1693 = vmatpush3.bf16.msra.mxu1 %v1119_v6  ;;  %1694 = vmatprep.mubr.msk.bf16.mxu1 %vm1825_vm1, %v1824_v0 }
 0x218   : > { %v824_v60 = vpop.permute.xlu1 %823  ;;  %v877_v13 = vsel %vm734_vm3, %v1757_v62, 0.0  ;;  %v970_v15 = vpack.c.bf16 %v1757_v62, %v1757_v62  ;;  %1704 = vmatprep.subr.bf16.mxu1 %v1824_v0 }
 0x219   : > { %1762 = vpow2.f32 %v849_v12  ;;  %v837_v16 = vsub.f32 %v2006_v10, %v824_v60  ;;  %878 = vadd.xlane.f32.xlu0 %v877_v13  ;;  %v861_v13 = vld [vmem:[#allocation3 + $0x30] sm:$0xff] }
 0x21a   : > { %1689 = vmatmul.mubr.msk.bf16.vlgmr.msra.gmra.mrb[20].mxu0 %vm734_vm3, %v970_v15 }
 0x21b   : > { %v1759_v63 = vpop.eup %1758  ;;  %v851_v18 = vmul.f32 1.442695, %v837_v16  ;;  %1699 = vmatpush3.bf16.msra.mxu0 %v1165_v9  ;;  %1700 = vmatprep.mubr.msk.bf16.mxu0 %vm1825_vm1, %v1824_v0 }
 0x21c   : > { %v829_v6 = vpop.permute.xlu1 %828  ;;  %v880_v19 = vsel %vm734_vm3, %v1759_v63, 0.0  ;;  %v971_v25 = vpack.c.bf16 %v1759_v63, %v1759_v63  ;;  %1710 = vmatprep.subr.bf16.mxu0 %v1824_v0 }
 0x21d   : > { %1764 = vpow2.f32 %v851_v18  ;;  %v838_v29 = vsub.f32 %v2008_v11, %v829_v6  ;;  %881 = vadd.xlane.f32.xlu1 %v880_v19  ;;  %v862_v6 = vld [vmem:[#allocation3 + $0x38] sm:$0xff] }
 0x21e   : > { %1695 = vmatmul.mubr.msk.bf16.vlgmr.msra.gmra.mrb[20].mxu1 %vm734_vm3, %v971_v25 }
 0x21f   : > { %v1761_v10 = vpop.eup %1760  ;;  %v853_v33 = vmul.f32 1.442695, %v838_v29  ;;  %1705 = vmatpush3.bf16.msra.mxu1 %v2114_v14  ;;  %1706 = vmatprep.mubr.msk.bf16.mxu1 %vm1825_vm1, %v1824_v0 }
 0x220   : > { %v883_v9 = vsel %vm734_vm3, %v1761_v10, 0.0  ;;  %v972_v35 = vpack.c.bf16 %v1761_v10, %v1761_v10  ;;  %1716 = vmatprep.subr.bf16.mxu1 %v1824_v0 }
 0x221   : > { %1766 = vpow2.f32 %v853_v33  ;;  %884 = vadd.xlane.f32.xlu0 %v883_v9 }
 0x222   : > { %1701 = vmatmul.mubr.msk.bf16.vlgmr.msra.gmra.mrb[24].mxu0 %vm734_vm3, %v972_v35 }
 0x223   : > { %v1763_v11 = vpop.eup %1762  ;;  %1711 = vmatpush3.bf16.msra.mxu0 %v2118_v17  ;;  %1712 = vmatprep.mubr.msk.bf16.mxu0 %vm1825_vm1, %v1824_v0 }
 0x224   : > { %v886_v14 = vsel %vm734_vm3, %v1763_v11, 0.0  ;;  %v973_v38 = vpack.c.bf16 %v1763_v11, %v1763_v11 }
 0x225   : > { %887 = vadd.xlane.f32.xlu1 %v886_v14  ;;  %v912_v14 = vld [vmem:[#allocation4] sm:$0xff] }
 0x226   : > { %1707 = vmatmul.mubr.msk.bf16.vlgmr.msra.gmra.mrb[24].mxu1 %vm734_vm3, %v973_v38 }
 0x227   : > { %v1765_v40 = vpop.eup %1764  ;;  %1717 = vmatpush3.bf16.msra.mxu1 %v2122_v21  ;;  %1718 = vmatprep.mubr.msk.bf16.mxu1 %vm1825_vm1, %v1824_v0  ;;  %v777_v21 = vmul.f32 1.442695, %v768_v28  ;;  %v775_v0 = vmul.f32 1.442695, %v767_v24  ;;  %v789_v24 = vmul.f32 1.442695, %v774_v5 }
 0x228   : > { %v889_v41 = vsel %vm734_vm3, %v1765_v40, 0.0  ;;  %v974_v44 = vpack.c.bf16 %v1765_v40, %v1765_v40  ;;  %v858_v5 = vld [vmem:[#allocation3 + $0x18] sm:$0xff] }
 0x229   : > { %890 = vadd.xlane.f32.xlu0 %v889_v41  ;;  %1768 = vpow2.f32 %v777_v21 }
 0x22a   : > { %1713 = vmatmul.mubr.msk.bf16.vlgmr.msra.gmra.mrb[28].mxu0 %vm734_vm3, %v974_v44  ;;  %1770 = vpow2.f32 %v775_v0  ;;  %v913_v44 = vld [vmem:[#allocation4 + $0x8] sm:$0xff] }
 0x22b   : > { %v1767_v17 = vpop.eup %1766  ;;  %1772 = vpow2.f32 %v779_v51 }
 0x22c   : > { %v892_v47 = vsel %vm734_vm3, %v1767_v17, 0.0  ;;  %v975_v48 = vpack.c.bf16 %v1767_v17, %v1767_v17  ;;  %1774 = vpow2.f32 %v781_v54  ;;  %v914_v54 = vld [vmem:[#allocation4 + $0x10] sm:$0xff] }
 0x22d   : > { %893 = vadd.xlane.f32.xlu1 %v892_v47  ;;  %1776 = vpow2.f32 %v783_v23 }
 0x22e   : > { %1719 = vmatmul.mubr.msk.bf16.vlgmr.msra.gmra.mrb[28].mxu1 %vm734_vm3, %v975_v48  ;;  %1778 = vpow2.f32 %v785_v20 }
 0x22f   : > { %1780 = vpow2.f32 %v787_v22 }
 0x230   : > { %1782 = vpow2.f32 %v789_v24 }
 0x233   : > { %v1769_v26 = vpop.eup %1768 }
 0x234   : > { %v1771_v27 = vpop.eup %1770  ;;  %v864_v50 = vmul.f32 %v1769_v26, %v856_v46  ;;  %v916_v46 = vld [vmem:[#allocation4 + $0x20] sm:$0xff] }
 0x235   : > { %v1773_v28 = vpop.eup %1772  ;;  %v863_v39 = vmul.f32 %v1771_v27, %v855_v37 }
 0x236   : > { %v1775_v30 = vpop.eup %1774  ;;  %v865_v1 = vmul.f32 %v1773_v28, %v857_v56 }
 0x237   : > { %v1777_v31 = vpop.eup %1776  ;;  %v866_v42 = vmul.f32 %v1775_v30, %v858_v5  ;;  %v917_v5 = vld [vmem:[#allocation4 + $0x28] sm:$0xff] }
 0x238   : > { %v1779_v32 = vpop.eup %1778  ;;  %v867_v52 = vmul.f32 %v1777_v31, %v859_v2 }
 0x239   : > { %v1781_v34 = vpop.eup %1780  ;;  %v868_v12 = vmul.f32 %v1779_v32, %v860_v7 }
 0x23a   : > { %v1783_v36 = vpop.eup %1782  ;;  %v869_v63 = vmul.f32 %v1781_v34, %v861_v13 }
 0x23b   : > { %v870_v29 = vmul.f32 %v1783_v36, %v862_v6 }
 0x23e   : > { %927 = vperm.xlu1 %1751, %v1769_v26  }
 0x23f   : > { %922 = vperm.xlu0 %1750, %v1771_v27  }
 0x242   : > { %932 = vperm.xlu1 %1751, %v1773_v28  }
 0x243   : > { %937 = vperm.xlu0 %1750, %v1775_v30   ;;  %v915_v30 = vld [vmem:[#allocation4 + $0x18] sm:$0xff] }
 0x246   : > { %942 = vperm.xlu1 %1751, %v1777_v31  }
 0x247   : > { %947 = vperm.xlu0 %1750, %v1779_v32  }
 0x24a   : > { %952 = vperm.xlu1 %1751, %v1781_v34  }
 0x24b   : > { %957 = vperm.xlu0 %1750, %v1783_v36  }
 0x29e   : > { %v873_v45 = vpop.xlane.xlu1 %872 }
 0x29f   : > { %v895_v49 = vadd.f32 %v873_v45, %v863_v39 }
 0x2a1   : > { %904 = vst.msk [vmem:[#allocation3] sm:$0xff] %vm283_vm2, %v895_v49 }
 0x2a2   : > { %v876_v55 = vpop.xlane.xlu0 %875 }
 0x2a3   : > { %v896_v61 = vadd.f32 %v876_v55, %v864_v50 }
 0x2a5   : > { %905 = vst.msk [vmem:[#allocation3 + $0x8] sm:$0xff] %vm283_vm2, %v896_v61 }
 0x2a6   : > { %v879_v4 = vpop.xlane.xlu0 %878 }
 0x2a7   : > { %v897_v57 = vadd.f32 %v879_v4, %v865_v1 }
 0x2a8   : > { %v1380_v58 = vld [vmem:[#allocation3] sm:$0xff] }
 0x2a9   : > { %906 = vst.msk [vmem:[#allocation3 + $0x10] sm:$0xff] %vm283_vm2, %v897_v57  ;;  %1390 = vperm.xlu1 %1751, %v1380_v58  }
 0x2aa   : > { %v882_v59 = vpop.xlane.xlu1 %881 }
 0x2ab   : > { %v898_v43 = vadd.f32 %v882_v59, %v866_v42 }
 0x2ac   : > { %v1381_v3 = vld [vmem:[#allocation3 + $0x8] sm:$0xff] }
 0x2ad   : > { %907 = vst.msk [vmem:[#allocation3 + $0x18] sm:$0xff] %vm283_vm2, %v898_v43  ;;  %1395 = vperm.xlu0 %1750, %v1381_v3  }
 0x2ae   : > { %v885_v53 = vpop.xlane.xlu0 %884 }
 0x2af   : > { %v899_v8 = vadd.f32 %v885_v53, %v867_v52  ;;  %v918_v52 = vld [vmem:[#allocation4 + $0x30] sm:$0xff] }
 0x2b0   : > { %v1382_v62 = vld [vmem:[#allocation3 + $0x10] sm:$0xff] }
 0x2b1   : > { %908 = vst.msk [vmem:[#allocation3 + $0x20] sm:$0xff] %vm283_vm2, %v899_v8  ;;  %1400 = vperm.xlu1 %1751, %v1382_v62  }
 0x2b2   : > { %v888_v60 = vpop.xlane.xlu1 %887 }
 0x2b3   : > { %v900_v15 = vadd.f32 %v888_v60, %v868_v12 }
 0x2b4   : > { %v1383_v16 = vld [vmem:[#allocation3 + $0x18] sm:$0xff] }
 0x2b5   : > { %909 = vst.msk [vmem:[#allocation3 + $0x28] sm:$0xff] %vm283_vm2, %v900_v15  ;;  %1405 = vperm.xlu0 %1750, %v1383_v16   ;;  %v919_v15 = vld [vmem:[#allocation4 + $0x38] sm:$0xff] }
 0x2b6   : > { %v891_v18 = vpop.xlane.xlu0 %890 }
 0x2b7   : > { %v901_v19 = vadd.f32 %v891_v18, %v869_v63 }
 0x2b8   : > { %v1384_v25 = vld [vmem:[#allocation3 + $0x20] sm:$0xff] }
 0x2b9   : > { %910 = vst.msk [vmem:[#allocation3 + $0x30] sm:$0xff] %vm283_vm2, %v901_v19  ;;  %1410 = vperm.xlu1 %1751, %v1384_v25  }
 0x2ba   : > { %v894_v10 = vpop.xlane.xlu1 %893 }
 0x2bb   : > { %v902_v33 = vadd.f32 %v894_v10, %v870_v29 }
 0x2bc   : > { %v1385_v9 = vld [vmem:[#allocation3 + $0x28] sm:$0xff] }
 0x2bd   : > { %911 = vst.msk [vmem:[#allocation3 + $0x38] sm:$0xff] %vm283_vm2, %v902_v33  ;;  %1415 = vperm.xlu0 %1750, %v1385_v9  }
 0x2be   : > { %v923_v38 = vpop.permute.xlu0 %922  ;;  %v928_v40 = vpop.permute.xlu1 %927 }
 0x2bf   : > { %v960_v41 = vmul.f32 %v923_v38, %v912_v14  ;;  %v961_v0 = vmul.f32 %v928_v40, %v913_v44 }
 0x2c0   : > { %v1386_v35 = vld [vmem:[#allocation3 + $0x30] sm:$0xff] }
 0x2c1   : > { %1420 = vperm.xlu1 %1751, %v1386_v35  }
 0x2c2   : > { %v933_v23 = vpop.permute.xlu1 %932  ;;  %v938_v31 = vpop.permute.xlu0 %937 }
 0x2c3   : > { %v962_v27 = vmul.f32 %v933_v23, %v914_v54  ;;  %v963_v39 = vmul.f32 %v938_v31, %v915_v30 }
 0x2c4   : > { %v1387_v11 = vld [vmem:[#allocation3 + $0x38] sm:$0xff] }
 0x2c5   : > { %1425 = vperm.xlu0 %1750, %v1387_v11  }
 0x2c6   : > { %v943_v49 = vpop.permute.xlu1 %942  ;;  %v948_v57 = vpop.permute.xlu0 %947 }
 0x2c7   : > { %v964_v1 = vmul.f32 %v943_v49, %v916_v46  ;;  %v965_v43 = vmul.f32 %v948_v57, %v917_v5 }
 0x2ca   : > { %v953_v53 = vpop.permute.xlu1 %952  ;;  %v958_v16 = vpop.permute.xlu0 %957 }
 0x2cb   : > { %v966_v60 = vmul.f32 %v953_v53, %v918_v52  ;;  %v967_v25 = vmul.f32 %v958_v16, %v919_v15 }
 0x2e5   : > { %v1017_v17 = vpop.f32.mrb[16].mxu0 }
 0x2e6   : > { %v1345_v47 = vadd.f32 %v1017_v17, %v960_v41  ;;  %v1678_v48 = vpop.f32.mrb[17].mxu0 }
 0x2e7   : > { %v1020_v21 = vpop.f32.mrb[18].mxu0 }
 0x2e8   : > { %1353 = vst.msk [vmem:[#allocation4] sm:$0xff] %vm300_vm0, %v1345_v47  ;;  %v1679_v51 = vpop.f32.mrb[19].mxu0 }
 0x2e9   : > { %v1063_v20 = vpop.f32.mrb[16].mxu1 }
 0x2ea   : > { %v1346_v22 = vadd.f32 %v1063_v20, %v961_v0  ;;  %v1684_v24 = vpop.f32.mrb[17].mxu1 }
 0x2eb   : > { %v1066_v26 = vpop.f32.mrb[18].mxu1 }
 0x2ec   : > { %1354 = vst.msk [vmem:[#allocation4 + $0x8] sm:$0xff] %vm300_vm0, %v1346_v22  ;;  %v1685_v28 = vpop.f32.mrb[19].mxu1 }
 0x2ed   : > { %v1109_v32 = vpop.f32.mrb[20].mxu0 }
 0x2ee   : > { %v1347_v34 = vadd.f32 %v1109_v32, %v962_v27  ;;  %v1690_v36 = vpop.f32.mrb[21].mxu0 }
 0x2ef   : > { %v1112_v37 = vpop.f32.mrb[22].mxu0  ;;  %v1372_v44 = vld [vmem:[#allocation4] sm:$0xff] }
 0x2f0   : > { %1355 = vst.msk [vmem:[#allocation4 + $0x10] sm:$0xff] %vm300_vm0, %v1347_v34  ;;  %v1691_v45 = vpop.f32.mrb[23].mxu0 }
 0x2f1   : > { %v1155_v50 = vpop.f32.mrb[20].mxu1 }
 0x2f2   : > { %v1348_v55 = vadd.f32 %v1155_v50, %v963_v39  ;;  %v1696_v56 = vpop.f32.mrb[21].mxu1 }
 0x2f3   : > { %v1158_v61 = vpop.f32.mrb[22].mxu1  ;;  %v1373_v21 = vld [vmem:[#allocation4 + $0x8] sm:$0xff] }
 0x2f4   : > { %1356 = vst.msk [vmem:[#allocation4 + $0x18] sm:$0xff] %vm300_vm0, %v1348_v55  ;;  %v1697_v4 = vpop.f32.mrb[23].mxu1 }
 0x2f5   : > { %v1201_v58 = vpop.f32.mrb[24].mxu0 }
 0x2f6   : > { %v1349_v42 = vadd.f32 %v1201_v58, %v964_v1  ;;  %v1702_v59 = vpop.f32.mrb[25].mxu0 }
 0x2f7   : > { %v1204_v2 = vpop.f32.mrb[26].mxu0  ;;  %v1374_v23 = vld [vmem:[#allocation4 + $0x10] sm:$0xff] }
 0x2f8   : > { %1357 = vst.msk [vmem:[#allocation4 + $0x20] sm:$0xff] %vm300_vm0, %v1349_v42  ;;  %v1703_v3 = vpop.f32.mrb[27].mxu0 }
 0x2f9   : > { %v1247_v7 = vpop.f32.mrb[24].mxu1 }
 0x2fa   : > { %v1350_v8 = vadd.f32 %v1247_v7, %v965_v43  ;;  %v1708_v62 = vpop.f32.mrb[25].mxu1 }
 0x2fb   : > { %v1250_v12 = vpop.f32.mrb[26].mxu1  ;;  %v1375_v26 = vld [vmem:[#allocation4 + $0x18] sm:$0xff] }
 0x2fc   : > { %1358 = vst.msk [vmem:[#allocation4 + $0x28] sm:$0xff] %vm300_vm0, %v1350_v8  ;;  %v1709_v13 = vpop.f32.mrb[27].mxu1 }
 0x2fd   : > { %v1293_v63 = vpop.f32.mrb[28].mxu0 }
 0x2fe   : > { %v1351_v18 = vadd.f32 %v1293_v63, %v966_v60  ;;  %v1714_v6 = vpop.f32.mrb[29].mxu0 }
 0x2ff   : > { %v1296_v19 = vpop.f32.mrb[30].mxu0  ;;  %v1376_v31 = vld [vmem:[#allocation4 + $0x20] sm:$0xff] }
 0x300   : > { %1359 = vst.msk [vmem:[#allocation4 + $0x30] sm:$0xff] %vm300_vm0, %v1351_v18  ;;  %v1715_v29 = vpop.f32.mrb[31].mxu0 }
 0x301   : > { %v1339_v10 = vpop.f32.mrb[28].mxu1 }
 0x302   : > { %v1352_v33 = vadd.f32 %v1339_v10, %v967_v25  ;;  %v1720_v9 = vpop.f32.mrb[29].mxu1 }
 0x303   : > { %v1342_v35 = vpop.f32.mrb[30].mxu1  ;;  %v1377_v37 = vld [vmem:[#allocation4 + $0x28] sm:$0xff] }
 0x304   : > { %1360 = vst.msk [vmem:[#allocation4 + $0x38] sm:$0xff] %vm300_vm0, %v1352_v33  ;;  %v1721_v11 = vpop.f32.mrb[31].mxu1 }
 0x307   : > { %v1378_v46 = vld [vmem:[#allocation4 + $0x30] sm:$0xff] }
 0x30b   : > { %v1379_v55 = vld [vmem:[#allocation4 + $0x38] sm:$0xff] }
 0x328   : > { %v1391_v14 = vpop.permute.xlu1 %1390 }
 0x329   : > { %1784 = vrcp.f32 %v1391_v14 }
 0x32c   : > { %v1396_v38 = vpop.permute.xlu0 %1395 }
 0x32d   : > { %1786 = vrcp.f32 %v1396_v38 }
 0x330   : > { %v1401_v40 = vpop.permute.xlu1 %1400 }
 0x331   : > { %1788 = vrcp.f32 %v1401_v40 }
 0x333   : > { %v1785_v41 = vpop.eup %1784 }
 0x334   : > { %v1429_v17 = vmul.f32 %v1785_v41, %v1372_v44  ;;  %v1406_v47 = vpop.permute.xlu0 %1405 }
 0x335   : > { %1790 = vrcp.f32 %v1406_v47 }
 0x336   : > { %1444 = vst.msk [vmem:[%s2211_s29] sm:$0xff] %vm300_vm0, %v1429_v17 }
 0x337   : > { %v1787_v48 = vpop.eup %1786 }
 0x338   : > { %v1431_v0 = vmul.f32 %v1787_v48, %v1373_v21  ;;  %v1411_v51 = vpop.permute.xlu1 %1410 }
 0x339   : > { %1792 = vrcp.f32 %v1411_v51 }
 0x33a   : > { %1445 = vst.msk [vmem:[%s2211_s29 + $0x8] sm:$0xff] %vm300_vm0, %v1431_v0 }
 0x33b   : > { %v1789_v54 = vpop.eup %1788 }
 0x33c   : > { %v1433_v20 = vmul.f32 %v1789_v54, %v1374_v23  ;;  %v1416_v22 = vpop.permute.xlu0 %1415 }
 0x33d   : > { %1794 = vrcp.f32 %v1416_v22 }
 0x33e   : > { %1446 = vst.msk [vmem:[%s2211_s29 + $0x10] sm:$0xff] %vm300_vm0, %v1433_v20 }
 0x33f   : > { %v1791_v24 = vpop.eup %1790 }
 0x340   : > { %v1435_v27 = vmul.f32 %v1791_v24, %v1375_v26  ;;  %v1421_v28 = vpop.permute.xlu1 %1420 }
 0x341   : > { %1796 = vrcp.f32 %v1421_v28 }
 0x342   : > { %1447 = vst.msk [vmem:[%s2211_s29 + $0x18] sm:$0xff] %vm300_vm0, %v1435_v27 }
 0x343   : > { %v1793_v30 = vpop.eup %1792 }
 0x344   : > { %v1437_v32 = vmul.f32 %v1793_v30, %v1376_v31  ;;  %v1426_v34 = vpop.permute.xlu0 %1425 }
 0x345   : > { %1798 = vrcp.f32 %v1426_v34 }
 0x346   : > { %1448 = vst.msk [vmem:[%s2211_s29 + $0x20] sm:$0xff] %vm300_vm0, %v1437_v32 }
 0x347   : > { %v1795_v36 = vpop.eup %1794 }
 0x348   : > { %v1439_v39 = vmul.f32 %v1795_v36, %v1377_v37 }
 0x34a   : > { %1449 = vst.msk [vmem:[%s2211_s29 + $0x28] sm:$0xff] %vm300_vm0, %v1439_v39 }
 0x34b   : > { %v1797_v45 = vpop.eup %1796 }
 0x34c   : > { %v1441_v49 = vmul.f32 %v1797_v45, %v1378_v46 }
 0x34e   : > { %1450 = vst.msk [vmem:[%s2211_s29 + $0x30] sm:$0xff] %vm300_vm0, %v1441_v49 }
 0x34f   : > { %v1799_v50 = vpop.eup %1798 }
 0x350   : > { %v1443_v56 = vmul.f32 %v1799_v50, %v1379_v55 }
 0x352   : > { %1451 = vst.msk [vmem:[%s2211_s29 + $0x38] sm:$0xff] %vm300_vm0, %v1443_v56 }
 0x353 PF: > { %s13_s14 = sadd.s32 1, %s1822_s14   ;;  %s2242_s12 = smov %s1818_s13 }
 0x354   : > { %p10_p5 = scmp.ge.s32.totalorder %s13_s14, 4   ;;  %s2243_s13 = smov %s2245_s15 }
 0x356   :  { %12 = sbr.rel (!%p10_p5) target bundleno = 2 (0x2), region = 76 }

</bundles_post_ra>
